<compile_context>
chip_gen: v7x
topology: tpu7x:2x2x1
jax: 0.10.0
libtpu: 0.0.40
codegen_flags: <defaults>
</compile_context>

<pallas_src>
import jax
import jax.numpy as jnp
import numpy as np
from jax.experimental import pallas as pl
from jax.experimental.pallas import tpu as pltpu

LAYER_NORM_EPS = 1e-12
UNROLL = 8  # rows per unrolled DMA-issue body (T is always a multiple of 8)


def _embeddings_kernel(ids_ref,        # SMEM  (B*S,) int32   (scalar prefetch)
                       tt_ref,         # VMEM  (T, 1)  int32
                       pos_ref,        # VMEM  (S, H)  resident position table
                       tt_tbl_ref,     # VMEM  (Vt, H)
                       gamma_ref,      # VMEM  (1, H)
                       beta_ref,       # VMEM  (1, H)
                       word_hbm_ref,   # HBM   (V, H)   (memory_space=pl.ANY)
                       out_ref,        # VMEM  (T, H)
                       gather_buf,     # VMEM scratch (2*T, H)  double buffer
                       sem):           # DMA semaphores (2,) - one per slot
    T, H = out_ref.shape
    V = word_hbm_ref.shape[0]
    b = pl.program_id(0)
    st = pl.program_id(1)
    n_st = pl.num_programs(1)
    slot = st & 1

    # ---- DMA gather: HBM word rows -> one slot of the VMEM double buffer.
    def issue_rows(token_base, slot_idx):
        buf_base = slot_idx * T

        def body(i, carry):
            r0 = i * UNROLL
            for u in range(UNROLL):                      # static partial unroll
                r = r0 + u
                row = jnp.clip(ids_ref[token_base + r], 0, V - 1)
                pltpu.make_async_copy(
                    word_hbm_ref.at[pl.ds(row, 1)],
                    gather_buf.at[pl.ds(buf_base + r, 1)],
                    sem.at[slot_idx],
                ).start()
            return carry

        jax.lax.fori_loop(0, T // UNROLL, body, 0)

    # Prologue: first seq tile of this batch row gathers into slot 0.
    @pl.when(st == 0)
    def _():
        issue_rows(b * n_st * T, 0)

    # Prefetch next seq tile's rows into the other slot; hidden behind this
    # step's LayerNorm + writeback.  Only looks forward within the same batch
    # row (inner axis is "arbitrary"), so it is megacore-safe and every issued
    # DMA is waited on the same core.
    @pl.when(st + 1 < n_st)
    def _():
        issue_rows((b * n_st + st + 1) * T, 1 - slot)

    # ---- Token-type select (VPU) + position slice while the gather is in flight.
    tt = tt_ref[...]                                     # (T, 1) int32
    tt_tbl = tt_tbl_ref[...].astype(jnp.float32)         # (Vt, H), tiny
    tt_e = jnp.broadcast_to(tt_tbl[0:1, :], (T, H))      # type 0 (hoisted)
    for t in range(1, tt_tbl_ref.shape[0]):              # static, tiny (1 iter)
        tt_e = jnp.where(tt == t, tt_tbl[t:t + 1, :], tt_e)
    pos_off = pl.multiple_of(st * T, 8)
    partial = tt_e + pos_ref[pl.ds(pos_off, T), :].astype(jnp.float32)

    # ---- Single wait covering all T row copies of the current slot.
    buf_off = pl.multiple_of(slot * T, 8)
    cur_view = gather_buf.at[pl.ds(buf_off, T)]
    pltpu.make_async_copy(cur_view, cur_view, sem.at[slot]).wait()

    emb = gather_buf[pl.ds(buf_off, T), :].astype(jnp.float32) + partial

    # ---- LayerNorm over the hidden dim + affine.
    mean = jnp.mean(emb, axis=-1, keepdims=True)
    centered = emb - mean
    var = jnp.mean(centered * centered, axis=-1, keepdims=True)
    normed = centered * jax.lax.rsqrt(var + LAYER_NORM_EPS)
    out = normed * gamma_ref[...].astype(jnp.float32) \
        + beta_ref[...].astype(jnp.float32)
    out_ref[...] = out.astype(out_ref.dtype)


def elasticbert_embeddings(input_ids, token_type_ids, params,
                           *, tokens_per_tile=None):
    B, S = input_ids.shape
    word_tbl = params["word_embeddings"]            # (V, H) - stays in HBM
    pos_tbl = params["position_embeddings"][:S]     # (S, H), positions 0..S-1
    tt_tbl = params["token_type_embeddings"]        # (Vt, H)
    gamma = params["ln_gamma"].reshape(1, -1)
    beta = params["ln_beta"].reshape(1, -1)
    H = word_tbl.shape[1]
    N = B * S

    # Tokens per grid step: multiple of 8 that divides S (big tiles amortize
    # per-step overhead and give more LN work to hide the gather behind).
    T = tokens_per_tile
    if T is None:
        T = min(S, 512)
        while S % T:
            T //= 2
    assert S % T == 0 and T % 8 == 0, (S, T)
    n_st = S // T

    ids_flat = input_ids.reshape(N).astype(jnp.int32)
    tt_flat = token_type_ids.reshape(N, 1).astype(jnp.int32)

    grid_spec = pltpu.PrefetchScalarGridSpec(
        num_scalar_prefetch=1,
        grid=(B, n_st),
        in_specs=[
            pl.BlockSpec((T, 1), lambda b, s, ids: (b * n_st + s, 0)),  # tt ids
            pl.BlockSpec((S, H), lambda b, s, ids: (0, 0)),             # pos table (resident)
            pl.BlockSpec(tt_tbl.shape, lambda b, s, ids: (0, 0)),       # tt table
            pl.BlockSpec((1, H), lambda b, s, ids: (0, 0)),             # gamma
            pl.BlockSpec((1, H), lambda b, s, ids: (0, 0)),             # beta
            pl.BlockSpec(memory_space=pl.ANY),                          # word table (HBM)
        ],
        out_specs=pl.BlockSpec((T, H), lambda b, s, ids: (b * n_st + s, 0)),
        scratch_shapes=[
            pltpu.VMEM((2 * T, H), word_tbl.dtype),   # double-buffered gather
            pltpu.SemaphoreType.DMA((2,)),            # one DMA sem per slot
        ],
    )

    out_flat = pl.pallas_call(
        _embeddings_kernel,
        out_shape=jax.ShapeDtypeStruct((N, H), jnp.float32),
        grid_spec=grid_spec,
        compiler_params=pltpu.CompilerParams(
            dimension_semantics=("parallel", "arbitrary")),
    )(ids_flat, tt_flat, pos_tbl, tt_tbl, gamma, beta, word_tbl)

    return out_flat.reshape(B, S, H)


def init_params(key, vocab_size, hidden_size, max_position_embeddings,
                type_vocab_size, pad_token_id):
    k1, k2, k3 = jax.random.split(key, 3)
    word = 0.02 * jax.random.normal(k1, (vocab_size, hidden_size), jnp.float32)
    word = word.at[pad_token_id].set(0.0)   # nn.Embedding padding_idx row = 0
    pos = 0.02 * jax.random.normal(k2, (max_position_embeddings, hidden_size),
                                   jnp.float32)
    tt = 0.02 * jax.random.normal(k3, (type_vocab_size, hidden_size),
                                  jnp.float32)
    return {
        "word_embeddings": word,
        "position_embeddings": pos,
        "token_type_embeddings": tt,
        "ln_gamma": jnp.ones((hidden_size,), jnp.float32),
        "ln_beta": jnp.zeros((hidden_size,), jnp.float32),
    }


def _reference(input_ids, token_type_ids, params):
    we = params["word_embeddings"][input_ids]
    tte = params["token_type_embeddings"][token_type_ids]
    pe = params["position_embeddings"][: input_ids.shape[1]][None]
    x = we + tte + pe
    mu = x.mean(-1, keepdims=True)
    var = ((x - mu) ** 2).mean(-1, keepdims=True)
    return ((x - mu) / jnp.sqrt(var + LAYER_NORM_EPS)) * params["ln_gamma"] \
        + params["ln_beta"]


if __name__ == "__main__":
    # Small config consistent with the module (H kept lane-aligned at 128).
    # S=16 with tokens_per_tile=8 gives n_st=2 so the double-buffered prefetch
    # path (prologue + cross-tile prefetch + both slots) is exercised.
    B, S = 2, 16
    vocab_size, hidden_size = 64, 128
    max_position_embeddings, type_vocab_size, pad_token_id = 32, 2, 0

    key = jax.random.PRNGKey(0)
    k_param, k_ids, k_tt = jax.random.split(key, 3)

    params = init_params(k_param, vocab_size, hidden_size,
                         max_position_embeddings, type_vocab_size,
                         pad_token_id)

    input_ids = jax.random.randint(k_ids, (B, S), 1, vocab_size, jnp.int32)
    token_type_ids = jax.random.randint(k_tt, (B, S), 0, type_vocab_size,
                                        jnp.int32)

    out = elasticbert_embeddings(input_ids, token_type_ids, params,
                                 tokens_per_tile=8)
    out = jax.block_until_ready(out)

    ref = _reference(input_ids, token_type_ids, params)
    np.testing.assert_allclose(np.asarray(out), np.asarray(ref),
                               rtol=1e-5, atol=1e-5)
    print("KERNEL_OK")
</pallas_src>

<mosaic_0001>
module attributes {stable_mosaic.version = 11 : i64} {
  func.func @_embeddings_kernel(%arg0: i32, %arg1: i32, %arg2: memref<32xi32, #tpu.memory_space<smem>>, %arg3: memref<8x1xi32, #tpu.memory_space<vmem>>, %arg4: memref<16x128xf32, #tpu.memory_space<vmem>>, %arg5: memref<2x128xf32, #tpu.memory_space<vmem>>, %arg6: memref<1x128xf32, #tpu.memory_space<vmem>>, %arg7: memref<1x128xf32, #tpu.memory_space<vmem>>, %arg8: memref<64x128xf32, #tpu.memory_space<any>>, %arg9: memref<8x128xf32, #tpu.memory_space<vmem>>, %arg10: memref<16x128xf32, #tpu.memory_space<vmem>>, %arg11: memref<2x!tpu.dma_semaphore, #tpu.memory_space<semaphore_mem>>) attributes {dimension_semantics = [#tpu.dimension_semantics<parallel>, #tpu.dimension_semantics<arbitrary>], iteration_bounds = array<i64: 2, 2>, scalar_prefetch = 1 : i64, scratch_operands = 2 : i64, tpu.core_type = #tpu.core_type<tc>, window_params = [{transform_indices = @transform_0, window_bounds = array<i64: 8, 1>}, {pipeline_mode = #tpu.pipeline_mode<synchronous>, transform_indices = @transform_1, window_bounds = array<i64: 16, 128>}, {pipeline_mode = #tpu.pipeline_mode<synchronous>, transform_indices = @transform_2, window_bounds = array<i64: 2, 128>}, {pipeline_mode = #tpu.pipeline_mode<synchronous>, transform_indices = @transform_3, window_bounds = array<i64: 1, 128>}, {pipeline_mode = #tpu.pipeline_mode<synchronous>, transform_indices = @transform_4, window_bounds = array<i64: 1, 128>}, {}, {transform_indices = @transform_6, window_bounds = array<i64: 8, 128>}]} {
    %c1_i32 = arith.constant 1 : i32
    %0 = arith.andi %arg1, %c1_i32 : i32
    %c0_i32 = arith.constant 0 : i32
    %1 = arith.cmpi eq, %arg1, %c0_i32 : i32
    %2 = arith.extui %1 : i1 to i32
    %c0_i32_0 = arith.constant 0 : i32
    %3 = arith.cmpi ne, %2, %c0_i32_0 : i32
    scf.if %3 {
      %c2_i32_22 = arith.constant 2 : i32
      %58 = arith.muli %arg0, %c2_i32_22 : i32
      %c8_i32_23 = arith.constant 8 : i32
      %59 = arith.muli %58, %c8_i32_23 : i32
      %c0_i32_24 = arith.constant 0 : i32
      %c8_i32_25 = arith.constant 8 : i32
      %60 = arith.muli %c0_i32_24, %c8_i32_25 : i32
      %c0_i32_26 = arith.constant 0 : i32
      %61 = arith.addi %60, %c0_i32_26 : i32
      %62 = arith.addi %59, %61 : i32
      %63 = arith.index_cast %62 : i32 to index
      %64 = memref.load %arg2[%63] : memref<32xi32, #tpu.memory_space<smem>>
      %c0_i32_27 = arith.constant 0 : i32
      %c63_i32 = arith.constant 63 : i32
      %65 = arith.maxsi %c0_i32_27, %64 : i32
      %66 = arith.minsi %c63_i32, %65 : i32
      %c0_i32_28 = arith.constant 0 : i32
      %67 = arith.addi %c0_i32_28, %61 : i32
      %c0_i32_29 = arith.constant 0 : i32
      %c0_i32_30 = arith.constant 0 : i32
      %68 = tpu.memref_slice %arg8[%66, %c0_i32_30] : memref<64x128xf32, #tpu.memory_space<any>> -> memref<1x128xf32, #tpu.memory_space<any>>
      %c0_i32_31 = arith.constant 0 : i32
      %69 = tpu.memref_slice %arg10[%67, %c0_i32_31] : memref<16x128xf32, #tpu.memory_space<vmem>> -> memref<1x128xf32, #tpu.memory_space<vmem>>
      %70 = tpu.memref_slice %arg11[%c0_i32_29] : memref<2x!tpu.dma_semaphore, #tpu.memory_space<semaphore_mem>> -> memref<1x!tpu.dma_semaphore, #tpu.memory_space<semaphore_mem>>
      %71 = tpu.memref_squeeze %70 : memref<1x!tpu.dma_semaphore, #tpu.memory_space<semaphore_mem>> -> memref<!tpu.dma_semaphore, #tpu.memory_space<semaphore_mem>>
      tpu.enqueue_dma source(%68 : memref<1x128xf32, #tpu.memory_space<any>>) target(%69 : memref<1x128xf32, #tpu.memory_space<vmem>>) target_semaphore(%71 : memref<!tpu.dma_semaphore, #tpu.memory_space<semaphore_mem>>)
      %c1_i32_32 = arith.constant 1 : i32
      %72 = arith.addi %60, %c1_i32_32 : i32
      %73 = arith.addi %59, %72 : i32
      %74 = arith.index_cast %73 : i32 to index
      %75 = memref.load %arg2[%74] : memref<32xi32, #tpu.memory_space<smem>>
      %c0_i32_33 = arith.constant 0 : i32
      %c63_i32_34 = arith.constant 63 : i32
      %76 = arith.maxsi %c0_i32_33, %75 : i32
      %77 = arith.minsi %c63_i32_34, %76 : i32
      %c0_i32_35 = arith.constant 0 : i32
      %78 = arith.addi %c0_i32_35, %72 : i32
      %c0_i32_36 = arith.constant 0 : i32
      %c0_i32_37 = arith.constant 0 : i32
      %79 = tpu.memref_slice %arg8[%77, %c0_i32_37] : memref<64x128xf32, #tpu.memory_space<any>> -> memref<1x128xf32, #tpu.memory_space<any>>
      %c0_i32_38 = arith.constant 0 : i32
      %80 = tpu.memref_slice %arg10[%78, %c0_i32_38] : memref<16x128xf32, #tpu.memory_space<vmem>> -> memref<1x128xf32, #tpu.memory_space<vmem>>
      %81 = tpu.memref_slice %arg11[%c0_i32_36] : memref<2x!tpu.dma_semaphore, #tpu.memory_space<semaphore_mem>> -> memref<1x!tpu.dma_semaphore, #tpu.memory_space<semaphore_mem>>
      %82 = tpu.memref_squeeze %81 : memref<1x!tpu.dma_semaphore, #tpu.memory_space<semaphore_mem>> -> memref<!tpu.dma_semaphore, #tpu.memory_space<semaphore_mem>>
      tpu.enqueue_dma source(%79 : memref<1x128xf32, #tpu.memory_space<any>>) target(%80 : memref<1x128xf32, #tpu.memory_space<vmem>>) target_semaphore(%82 : memref<!tpu.dma_semaphore, #tpu.memory_space<semaphore_mem>>)
      %c2_i32_39 = arith.constant 2 : i32
      %83 = arith.addi %60, %c2_i32_39 : i32
      %84 = arith.addi %59, %83 : i32
      %85 = arith.index_cast %84 : i32 to index
      %86 = memref.load %arg2[%85] : memref<32xi32, #tpu.memory_space<smem>>
      %c0_i32_40 = arith.constant 0 : i32
      %c63_i32_41 = arith.constant 63 : i32
      %87 = arith.maxsi %c0_i32_40, %86 : i32
      %88 = arith.minsi %c63_i32_41, %87 : i32
      %c0_i32_42 = arith.constant 0 : i32
      %89 = arith.addi %c0_i32_42, %83 : i32
      %c0_i32_43 = arith.constant 0 : i32
      %c0_i32_44 = arith.constant 0 : i32
      %90 = tpu.memref_slice %arg8[%88, %c0_i32_44] : memref<64x128xf32, #tpu.memory_space<any>> -> memref<1x128xf32, #tpu.memory_space<any>>
      %c0_i32_45 = arith.constant 0 : i32
      %91 = tpu.memref_slice %arg10[%89, %c0_i32_45] : memref<16x128xf32, #tpu.memory_space<vmem>> -> memref<1x128xf32, #tpu.memory_space<vmem>>
      %92 = tpu.memref_slice %arg11[%c0_i32_43] : memref<2x!tpu.dma_semaphore, #tpu.memory_space<semaphore_mem>> -> memref<1x!tpu.dma_semaphore, #tpu.memory_space<semaphore_mem>>
      %93 = tpu.memref_squeeze %92 : memref<1x!tpu.dma_semaphore, #tpu.memory_space<semaphore_mem>> -> memref<!tpu.dma_semaphore, #tpu.memory_space<semaphore_mem>>
      tpu.enqueue_dma source(%90 : memref<1x128xf32, #tpu.memory_space<any>>) target(%91 : memref<1x128xf32, #tpu.memory_space<vmem>>) target_semaphore(%93 : memref<!tpu.dma_semaphore, #tpu.memory_space<semaphore_mem>>)
      %c3_i32 = arith.constant 3 : i32
      %94 = arith.addi %60, %c3_i32 : i32
      %95 = arith.addi %59, %94 : i32
      %96 = arith.index_cast %95 : i32 to index
      %97 = memref.load %arg2[%96] : memref<32xi32, #tpu.memory_space<smem>>
      %c0_i32_46 = arith.constant 0 : i32
      %c63_i32_47 = arith.constant 63 : i32
      %98 = arith.maxsi %c0_i32_46, %97 : i32
      %99 = arith.minsi %c63_i32_47, %98 : i32
      %c0_i32_48 = arith.constant 0 : i32
      %100 = arith.addi %c0_i32_48, %94 : i32
      %c0_i32_49 = arith.constant 0 : i32
      %c0_i32_50 = arith.constant 0 : i32
      %101 = tpu.memref_slice %arg8[%99, %c0_i32_50] : memref<64x128xf32, #tpu.memory_space<any>> -> memref<1x128xf32, #tpu.memory_space<any>>
      %c0_i32_51 = arith.constant 0 : i32
      %102 = tpu.memref_slice %arg10[%100, %c0_i32_51] : memref<16x128xf32, #tpu.memory_space<vmem>> -> memref<1x128xf32, #tpu.memory_space<vmem>>
      %103 = tpu.memref_slice %arg11[%c0_i32_49] : memref<2x!tpu.dma_semaphore, #tpu.memory_space<semaphore_mem>> -> memref<1x!tpu.dma_semaphore, #tpu.memory_space<semaphore_mem>>
      %104 = tpu.memref_squeeze %103 : memref<1x!tpu.dma_semaphore, #tpu.memory_space<semaphore_mem>> -> memref<!tpu.dma_semaphore, #tpu.memory_space<semaphore_mem>>
      tpu.enqueue_dma source(%101 : memref<1x128xf32, #tpu.memory_space<any>>) target(%102 : memref<1x128xf32, #tpu.memory_space<vmem>>) target_semaphore(%104 : memref<!tpu.dma_semaphore, #tpu.memory_space<semaphore_mem>>)
      %c4_i32 = arith.constant 4 : i32
      %105 = arith.addi %60, %c4_i32 : i32
      %106 = arith.addi %59, %105 : i32
      %107 = arith.index_cast %106 : i32 to index
      %108 = memref.load %arg2[%107] : memref<32xi32, #tpu.memory_space<smem>>
      %c0_i32_52 = arith.constant 0 : i32
      %c63_i32_53 = arith.constant 63 : i32
      %109 = arith.maxsi %c0_i32_52, %108 : i32
      %110 = arith.minsi %c63_i32_53, %109 : i32
      %c0_i32_54 = arith.constant 0 : i32
      %111 = arith.addi %c0_i32_54, %105 : i32
      %c0_i32_55 = arith.constant 0 : i32
      %c0_i32_56 = arith.constant 0 : i32
      %112 = tpu.memref_slice %arg8[%110, %c0_i32_56] : memref<64x128xf32, #tpu.memory_space<any>> -> memref<1x128xf32, #tpu.memory_space<any>>
      %c0_i32_57 = arith.constant 0 : i32
      %113 = tpu.memref_slice %arg10[%111, %c0_i32_57] : memref<16x128xf32, #tpu.memory_space<vmem>> -> memref<1x128xf32, #tpu.memory_space<vmem>>
      %114 = tpu.memref_slice %arg11[%c0_i32_55] : memref<2x!tpu.dma_semaphore, #tpu.memory_space<semaphore_mem>> -> memref<1x!tpu.dma_semaphore, #tpu.memory_space<semaphore_mem>>
      %115 = tpu.memref_squeeze %114 : memref<1x!tpu.dma_semaphore, #tpu.memory_space<semaphore_mem>> -> memref<!tpu.dma_semaphore, #tpu.memory_space<semaphore_mem>>
      tpu.enqueue_dma source(%112 : memref<1x128xf32, #tpu.memory_space<any>>) target(%113 : memref<1x128xf32, #tpu.memory_space<vmem>>) target_semaphore(%115 : memref<!tpu.dma_semaphore, #tpu.memory_space<semaphore_mem>>)
      %c5_i32 = arith.constant 5 : i32
      %116 = arith.addi %60, %c5_i32 : i32
      %117 = arith.addi %59, %116 : i32
      %118 = arith.index_cast %117 : i32 to index
      %119 = memref.load %arg2[%118] : memref<32xi32, #tpu.memory_space<smem>>
      %c0_i32_58 = arith.constant 0 : i32
      %c63_i32_59 = arith.constant 63 : i32
      %120 = arith.maxsi %c0_i32_58, %119 : i32
      %121 = arith.minsi %c63_i32_59, %120 : i32
      %c0_i32_60 = arith.constant 0 : i32
      %122 = arith.addi %c0_i32_60, %116 : i32
      %c0_i32_61 = arith.constant 0 : i32
      %c0_i32_62 = arith.constant 0 : i32
      %123 = tpu.memref_slice %arg8[%121, %c0_i32_62] : memref<64x128xf32, #tpu.memory_space<any>> -> memref<1x128xf32, #tpu.memory_space<any>>
      %c0_i32_63 = arith.constant 0 : i32
      %124 = tpu.memref_slice %arg10[%122, %c0_i32_63] : memref<16x128xf32, #tpu.memory_space<vmem>> -> memref<1x128xf32, #tpu.memory_space<vmem>>
      %125 = tpu.memref_slice %arg11[%c0_i32_61] : memref<2x!tpu.dma_semaphore, #tpu.memory_space<semaphore_mem>> -> memref<1x!tpu.dma_semaphore, #tpu.memory_space<semaphore_mem>>
      %126 = tpu.memref_squeeze %125 : memref<1x!tpu.dma_semaphore, #tpu.memory_space<semaphore_mem>> -> memref<!tpu.dma_semaphore, #tpu.memory_space<semaphore_mem>>
      tpu.enqueue_dma source(%123 : memref<1x128xf32, #tpu.memory_space<any>>) target(%124 : memref<1x128xf32, #tpu.memory_space<vmem>>) target_semaphore(%126 : memref<!tpu.dma_semaphore, #tpu.memory_space<semaphore_mem>>)
      %c6_i32 = arith.constant 6 : i32
      %127 = arith.addi %60, %c6_i32 : i32
      %128 = arith.addi %59, %127 : i32
      %129 = arith.index_cast %128 : i32 to index
      %130 = memref.load %arg2[%129] : memref<32xi32, #tpu.memory_space<smem>>
      %c0_i32_64 = arith.constant 0 : i32
      %c63_i32_65 = arith.constant 63 : i32
      %131 = arith.maxsi %c0_i32_64, %130 : i32
      %132 = arith.minsi %c63_i32_65, %131 : i32
      %c0_i32_66 = arith.constant 0 : i32
      %133 = arith.addi %c0_i32_66, %127 : i32
      %c0_i32_67 = arith.constant 0 : i32
      %c0_i32_68 = arith.constant 0 : i32
      %134 = tpu.memref_slice %arg8[%132, %c0_i32_68] : memref<64x128xf32, #tpu.memory_space<any>> -> memref<1x128xf32, #tpu.memory_space<any>>
      %c0_i32_69 = arith.constant 0 : i32
      %135 = tpu.memref_slice %arg10[%133, %c0_i32_69] : memref<16x128xf32, #tpu.memory_space<vmem>> -> memref<1x128xf32, #tpu.memory_space<vmem>>
      %136 = tpu.memref_slice %arg11[%c0_i32_67] : memref<2x!tpu.dma_semaphore, #tpu.memory_space<semaphore_mem>> -> memref<1x!tpu.dma_semaphore, #tpu.memory_space<semaphore_mem>>
      %137 = tpu.memref_squeeze %136 : memref<1x!tpu.dma_semaphore, #tpu.memory_space<semaphore_mem>> -> memref<!tpu.dma_semaphore, #tpu.memory_space<semaphore_mem>>
      tpu.enqueue_dma source(%134 : memref<1x128xf32, #tpu.memory_space<any>>) target(%135 : memref<1x128xf32, #tpu.memory_space<vmem>>) target_semaphore(%137 : memref<!tpu.dma_semaphore, #tpu.memory_space<semaphore_mem>>)
      %c7_i32 = arith.constant 7 : i32
      %138 = arith.addi %60, %c7_i32 : i32
      %139 = arith.addi %59, %138 : i32
      %140 = arith.index_cast %139 : i32 to index
      %141 = memref.load %arg2[%140] : memref<32xi32, #tpu.memory_space<smem>>
      %c0_i32_70 = arith.constant 0 : i32
      %c63_i32_71 = arith.constant 63 : i32
      %142 = arith.maxsi %c0_i32_70, %141 : i32
      %143 = arith.minsi %c63_i32_71, %142 : i32
      %c0_i32_72 = arith.constant 0 : i32
      %144 = arith.addi %c0_i32_72, %138 : i32
      %c0_i32_73 = arith.constant 0 : i32
      %c0_i32_74 = arith.constant 0 : i32
      %145 = tpu.memref_slice %arg8[%143, %c0_i32_74] : memref<64x128xf32, #tpu.memory_space<any>> -> memref<1x128xf32, #tpu.memory_space<any>>
      %c0_i32_75 = arith.constant 0 : i32
      %146 = tpu.memref_slice %arg10[%144, %c0_i32_75] : memref<16x128xf32, #tpu.memory_space<vmem>> -> memref<1x128xf32, #tpu.memory_space<vmem>>
      %147 = tpu.memref_slice %arg11[%c0_i32_73] : memref<2x!tpu.dma_semaphore, #tpu.memory_space<semaphore_mem>> -> memref<1x!tpu.dma_semaphore, #tpu.memory_space<semaphore_mem>>
      %148 = tpu.memref_squeeze %147 : memref<1x!tpu.dma_semaphore, #tpu.memory_space<semaphore_mem>> -> memref<!tpu.dma_semaphore, #tpu.memory_space<semaphore_mem>>
      tpu.enqueue_dma source(%145 : memref<1x128xf32, #tpu.memory_space<any>>) target(%146 : memref<1x128xf32, #tpu.memory_space<vmem>>) target_semaphore(%148 : memref<!tpu.dma_semaphore, #tpu.memory_space<semaphore_mem>>)
      %c1_i32_76 = arith.constant 1 : i32
    } else {
    }
    %c1_i32_1 = arith.constant 1 : i32
    %4 = arith.addi %arg1, %c1_i32_1 : i32
    %c2_i32 = arith.constant 2 : i32
    %5 = arith.cmpi slt, %4, %c2_i32 : i32
    %6 = arith.extui %5 : i1 to i32
    %c0_i32_2 = arith.constant 0 : i32
    %7 = arith.cmpi ne, %6, %c0_i32_2 : i32
    scf.if %7 {
      %c2_i32_22 = arith.constant 2 : i32
      %58 = arith.muli %arg0, %c2_i32_22 : i32
      %59 = arith.addi %58, %arg1 : i32
      %c1_i32_23 = arith.constant 1 : i32
      %60 = arith.addi %59, %c1_i32_23 : i32
      %c8_i32_24 = arith.constant 8 : i32
      %61 = arith.muli %60, %c8_i32_24 : i32
      %c1_i32_25 = arith.constant 1 : i32
      %62 = arith.subi %c1_i32_25, %0 : i32
      %c8_i32_26 = arith.constant 8 : i32
      %63 = arith.muli %62, %c8_i32_26 : i32
      %c0_i32_27 = arith.constant 0 : i32
      %c8_i32_28 = arith.constant 8 : i32
      %64 = arith.muli %c0_i32_27, %c8_i32_28 : i32
      %c0_i32_29 = arith.constant 0 : i32
      %65 = arith.addi %64, %c0_i32_29 : i32
      %66 = arith.addi %61, %65 : i32
      %67 = arith.index_cast %66 : i32 to index
      %68 = memref.load %arg2[%67] : memref<32xi32, #tpu.memory_space<smem>>
      %c0_i32_30 = arith.constant 0 : i32
      %c63_i32 = arith.constant 63 : i32
      %69 = arith.maxsi %c0_i32_30, %68 : i32
      %70 = arith.minsi %c63_i32, %69 : i32
      %71 = arith.addi %63, %65 : i32
      %c0_i32_31 = arith.constant 0 : i32
      %72 = tpu.memref_slice %arg8[%70, %c0_i32_31] : memref<64x128xf32, #tpu.memory_space<any>> -> memref<1x128xf32, #tpu.memory_space<any>>
      %c0_i32_32 = arith.constant 0 : i32
      %73 = tpu.memref_slice %arg10[%71, %c0_i32_32] : memref<16x128xf32, #tpu.memory_space<vmem>> -> memref<1x128xf32, #tpu.memory_space<vmem>>
      %74 = tpu.memref_slice %arg11[%62] : memref<2x!tpu.dma_semaphore, #tpu.memory_space<semaphore_mem>> -> memref<1x!tpu.dma_semaphore, #tpu.memory_space<semaphore_mem>>
      %75 = tpu.memref_squeeze %74 : memref<1x!tpu.dma_semaphore, #tpu.memory_space<semaphore_mem>> -> memref<!tpu.dma_semaphore, #tpu.memory_space<semaphore_mem>>
      tpu.enqueue_dma source(%72 : memref<1x128xf32, #tpu.memory_space<any>>) target(%73 : memref<1x128xf32, #tpu.memory_space<vmem>>) target_semaphore(%75 : memref<!tpu.dma_semaphore, #tpu.memory_space<semaphore_mem>>)
      %c1_i32_33 = arith.constant 1 : i32
      %76 = arith.addi %64, %c1_i32_33 : i32
      %77 = arith.addi %61, %76 : i32
      %78 = arith.index_cast %77 : i32 to index
      %79 = memref.load %arg2[%78] : memref<32xi32, #tpu.memory_space<smem>>
      %c0_i32_34 = arith.constant 0 : i32
      %c63_i32_35 = arith.constant 63 : i32
      %80 = arith.maxsi %c0_i32_34, %79 : i32
      %81 = arith.minsi %c63_i32_35, %80 : i32
      %82 = arith.addi %63, %76 : i32
      %c0_i32_36 = arith.constant 0 : i32
      %83 = tpu.memref_slice %arg8[%81, %c0_i32_36] : memref<64x128xf32, #tpu.memory_space<any>> -> memref<1x128xf32, #tpu.memory_space<any>>
      %c0_i32_37 = arith.constant 0 : i32
      %84 = tpu.memref_slice %arg10[%82, %c0_i32_37] : memref<16x128xf32, #tpu.memory_space<vmem>> -> memref<1x128xf32, #tpu.memory_space<vmem>>
      %85 = tpu.memref_slice %arg11[%62] : memref<2x!tpu.dma_semaphore, #tpu.memory_space<semaphore_mem>> -> memref<1x!tpu.dma_semaphore, #tpu.memory_space<semaphore_mem>>
      %86 = tpu.memref_squeeze %85 : memref<1x!tpu.dma_semaphore, #tpu.memory_space<semaphore_mem>> -> memref<!tpu.dma_semaphore, #tpu.memory_space<semaphore_mem>>
      tpu.enqueue_dma source(%83 : memref<1x128xf32, #tpu.memory_space<any>>) target(%84 : memref<1x128xf32, #tpu.memory_space<vmem>>) target_semaphore(%86 : memref<!tpu.dma_semaphore, #tpu.memory_space<semaphore_mem>>)
      %c2_i32_38 = arith.constant 2 : i32
      %87 = arith.addi %64, %c2_i32_38 : i32
      %88 = arith.addi %61, %87 : i32
      %89 = arith.index_cast %88 : i32 to index
      %90 = memref.load %arg2[%89] : memref<32xi32, #tpu.memory_space<smem>>
      %c0_i32_39 = arith.constant 0 : i32
      %c63_i32_40 = arith.constant 63 : i32
      %91 = arith.maxsi %c0_i32_39, %90 : i32
      %92 = arith.minsi %c63_i32_40, %91 : i32
      %93 = arith.addi %63, %87 : i32
      %c0_i32_41 = arith.constant 0 : i32
      %94 = tpu.memref_slice %arg8[%92, %c0_i32_41] : memref<64x128xf32, #tpu.memory_space<any>> -> memref<1x128xf32, #tpu.memory_space<any>>
      %c0_i32_42 = arith.constant 0 : i32
      %95 = tpu.memref_slice %arg10[%93, %c0_i32_42] : memref<16x128xf32, #tpu.memory_space<vmem>> -> memref<1x128xf32, #tpu.memory_space<vmem>>
      %96 = tpu.memref_slice %arg11[%62] : memref<2x!tpu.dma_semaphore, #tpu.memory_space<semaphore_mem>> -> memref<1x!tpu.dma_semaphore, #tpu.memory_space<semaphore_mem>>
      %97 = tpu.memref_squeeze %96 : memref<1x!tpu.dma_semaphore, #tpu.memory_space<semaphore_mem>> -> memref<!tpu.dma_semaphore, #tpu.memory_space<semaphore_mem>>
      tpu.enqueue_dma source(%94 : memref<1x128xf32, #tpu.memory_space<any>>) target(%95 : memref<1x128xf32, #tpu.memory_space<vmem>>) target_semaphore(%97 : memref<!tpu.dma_semaphore, #tpu.memory_space<semaphore_mem>>)
      %c3_i32 = arith.constant 3 : i32
      %98 = arith.addi %64, %c3_i32 : i32
      %99 = arith.addi %61, %98 : i32
      %100 = arith.index_cast %99 : i32 to index
      %101 = memref.load %arg2[%100] : memref<32xi32, #tpu.memory_space<smem>>
      %c0_i32_43 = arith.constant 0 : i32
      %c63_i32_44 = arith.constant 63 : i32
      %102 = arith.maxsi %c0_i32_43, %101 : i32
      %103 = arith.minsi %c63_i32_44, %102 : i32
      %104 = arith.addi %63, %98 : i32
      %c0_i32_45 = arith.constant 0 : i32
      %105 = tpu.memref_slice %arg8[%103, %c0_i32_45] : memref<64x128xf32, #tpu.memory_space<any>> -> memref<1x128xf32, #tpu.memory_space<any>>
      %c0_i32_46 = arith.constant 0 : i32
      %106 = tpu.memref_slice %arg10[%104, %c0_i32_46] : memref<16x128xf32, #tpu.memory_space<vmem>> -> memref<1x128xf32, #tpu.memory_space<vmem>>
      %107 = tpu.memref_slice %arg11[%62] : memref<2x!tpu.dma_semaphore, #tpu.memory_space<semaphore_mem>> -> memref<1x!tpu.dma_semaphore, #tpu.memory_space<semaphore_mem>>
      %108 = tpu.memref_squeeze %107 : memref<1x!tpu.dma_semaphore, #tpu.memory_space<semaphore_mem>> -> memref<!tpu.dma_semaphore, #tpu.memory_space<semaphore_mem>>
      tpu.enqueue_dma source(%105 : memref<1x128xf32, #tpu.memory_space<any>>) target(%106 : memref<1x128xf32, #tpu.memory_space<vmem>>) target_semaphore(%108 : memref<!tpu.dma_semaphore, #tpu.memory_space<semaphore_mem>>)
      %c4_i32 = arith.constant 4 : i32
      %109 = arith.addi %64, %c4_i32 : i32
      %110 = arith.addi %61, %109 : i32
      %111 = arith.index_cast %110 : i32 to index
      %112 = memref.load %arg2[%111] : memref<32xi32, #tpu.memory_space<smem>>
      %c0_i32_47 = arith.constant 0 : i32
      %c63_i32_48 = arith.constant 63 : i32
      %113 = arith.maxsi %c0_i32_47, %112 : i32
      %114 = arith.minsi %c63_i32_48, %113 : i32
      %115 = arith.addi %63, %109 : i32
      %c0_i32_49 = arith.constant 0 : i32
      %116 = tpu.memref_slice %arg8[%114, %c0_i32_49] : memref<64x128xf32, #tpu.memory_space<any>> -> memref<1x128xf32, #tpu.memory_space<any>>
      %c0_i32_50 = arith.constant 0 : i32
      %117 = tpu.memref_slice %arg10[%115, %c0_i32_50] : memref<16x128xf32, #tpu.memory_space<vmem>> -> memref<1x128xf32, #tpu.memory_space<vmem>>
      %118 = tpu.memref_slice %arg11[%62] : memref<2x!tpu.dma_semaphore, #tpu.memory_space<semaphore_mem>> -> memref<1x!tpu.dma_semaphore, #tpu.memory_space<semaphore_mem>>
      %119 = tpu.memref_squeeze %118 : memref<1x!tpu.dma_semaphore, #tpu.memory_space<semaphore_mem>> -> memref<!tpu.dma_semaphore, #tpu.memory_space<semaphore_mem>>
      tpu.enqueue_dma source(%116 : memref<1x128xf32, #tpu.memory_space<any>>) target(%117 : memref<1x128xf32, #tpu.memory_space<vmem>>) target_semaphore(%119 : memref<!tpu.dma_semaphore, #tpu.memory_space<semaphore_mem>>)
      %c5_i32 = arith.constant 5 : i32
      %120 = arith.addi %64, %c5_i32 : i32
      %121 = arith.addi %61, %120 : i32
      %122 = arith.index_cast %121 : i32 to index
      %123 = memref.load %arg2[%122] : memref<32xi32, #tpu.memory_space<smem>>
      %c0_i32_51 = arith.constant 0 : i32
      %c63_i32_52 = arith.constant 63 : i32
      %124 = arith.maxsi %c0_i32_51, %123 : i32
      %125 = arith.minsi %c63_i32_52, %124 : i32
      %126 = arith.addi %63, %120 : i32
      %c0_i32_53 = arith.constant 0 : i32
      %127 = tpu.memref_slice %arg8[%125, %c0_i32_53] : memref<64x128xf32, #tpu.memory_space<any>> -> memref<1x128xf32, #tpu.memory_space<any>>
      %c0_i32_54 = arith.constant 0 : i32
      %128 = tpu.memref_slice %arg10[%126, %c0_i32_54] : memref<16x128xf32, #tpu.memory_space<vmem>> -> memref<1x128xf32, #tpu.memory_space<vmem>>
      %129 = tpu.memref_slice %arg11[%62] : memref<2x!tpu.dma_semaphore, #tpu.memory_space<semaphore_mem>> -> memref<1x!tpu.dma_semaphore, #tpu.memory_space<semaphore_mem>>
      %130 = tpu.memref_squeeze %129 : memref<1x!tpu.dma_semaphore, #tpu.memory_space<semaphore_mem>> -> memref<!tpu.dma_semaphore, #tpu.memory_space<semaphore_mem>>
      tpu.enqueue_dma source(%127 : memref<1x128xf32, #tpu.memory_space<any>>) target(%128 : memref<1x128xf32, #tpu.memory_space<vmem>>) target_semaphore(%130 : memref<!tpu.dma_semaphore, #tpu.memory_space<semaphore_mem>>)
      %c6_i32 = arith.constant 6 : i32
      %131 = arith.addi %64, %c6_i32 : i32
      %132 = arith.addi %61, %131 : i32
      %133 = arith.index_cast %132 : i32 to index
      %134 = memref.load %arg2[%133] : memref<32xi32, #tpu.memory_space<smem>>
      %c0_i32_55 = arith.constant 0 : i32
      %c63_i32_56 = arith.constant 63 : i32
      %135 = arith.maxsi %c0_i32_55, %134 : i32
      %136 = arith.minsi %c63_i32_56, %135 : i32
      %137 = arith.addi %63, %131 : i32
      %c0_i32_57 = arith.constant 0 : i32
      %138 = tpu.memref_slice %arg8[%136, %c0_i32_57] : memref<64x128xf32, #tpu.memory_space<any>> -> memref<1x128xf32, #tpu.memory_space<any>>
      %c0_i32_58 = arith.constant 0 : i32
      %139 = tpu.memref_slice %arg10[%137, %c0_i32_58] : memref<16x128xf32, #tpu.memory_space<vmem>> -> memref<1x128xf32, #tpu.memory_space<vmem>>
      %140 = tpu.memref_slice %arg11[%62] : memref<2x!tpu.dma_semaphore, #tpu.memory_space<semaphore_mem>> -> memref<1x!tpu.dma_semaphore, #tpu.memory_space<semaphore_mem>>
      %141 = tpu.memref_squeeze %140 : memref<1x!tpu.dma_semaphore, #tpu.memory_space<semaphore_mem>> -> memref<!tpu.dma_semaphore, #tpu.memory_space<semaphore_mem>>
      tpu.enqueue_dma source(%138 : memref<1x128xf32, #tpu.memory_space<any>>) target(%139 : memref<1x128xf32, #tpu.memory_space<vmem>>) target_semaphore(%141 : memref<!tpu.dma_semaphore, #tpu.memory_space<semaphore_mem>>)
      %c7_i32 = arith.constant 7 : i32
      %142 = arith.addi %64, %c7_i32 : i32
      %143 = arith.addi %61, %142 : i32
      %144 = arith.index_cast %143 : i32 to index
      %145 = memref.load %arg2[%144] : memref<32xi32, #tpu.memory_space<smem>>
      %c0_i32_59 = arith.constant 0 : i32
      %c63_i32_60 = arith.constant 63 : i32
      %146 = arith.maxsi %c0_i32_59, %145 : i32
      %147 = arith.minsi %c63_i32_60, %146 : i32
      %148 = arith.addi %63, %142 : i32
      %c0_i32_61 = arith.constant 0 : i32
      %149 = tpu.memref_slice %arg8[%147, %c0_i32_61] : memref<64x128xf32, #tpu.memory_space<any>> -> memref<1x128xf32, #tpu.memory_space<any>>
      %c0_i32_62 = arith.constant 0 : i32
      %150 = tpu.memref_slice %arg10[%148, %c0_i32_62] : memref<16x128xf32, #tpu.memory_space<vmem>> -> memref<1x128xf32, #tpu.memory_space<vmem>>
      %151 = tpu.memref_slice %arg11[%62] : memref<2x!tpu.dma_semaphore, #tpu.memory_space<semaphore_mem>> -> memref<1x!tpu.dma_semaphore, #tpu.memory_space<semaphore_mem>>
      %152 = tpu.memref_squeeze %151 : memref<1x!tpu.dma_semaphore, #tpu.memory_space<semaphore_mem>> -> memref<!tpu.dma_semaphore, #tpu.memory_space<semaphore_mem>>
      tpu.enqueue_dma source(%149 : memref<1x128xf32, #tpu.memory_space<any>>) target(%150 : memref<1x128xf32, #tpu.memory_space<vmem>>) target_semaphore(%152 : memref<!tpu.dma_semaphore, #tpu.memory_space<semaphore_mem>>)
      %c1_i32_63 = arith.constant 1 : i32
    } else {
    }
    %c0 = arith.constant 0 : index
    %c0_3 = arith.constant 0 : index
    %8 = vector.load %arg3[%c0, %c0_3] : memref<8x1xi32, #tpu.memory_space<vmem>>, vector<8x1xi32>
    %c0_4 = arith.constant 0 : index
    %c0_5 = arith.constant 0 : index
    %9 = vector.load %arg5[%c0_4, %c0_5] : memref<2x128xf32, #tpu.memory_space<vmem>>, vector<2x128xf32>
    %10 = vector.extract_strided_slice %9 {offsets = [0, 0], sizes = [1, 128], strides = [1, 1]} : vector<2x128xf32> to vector<1x128xf32>
    %11 = vector.shape_cast %10 : vector<1x128xf32> to vector<1x128xf32>
    %12 = vector.broadcast %11 : vector<1x128xf32> to vector<8x128xf32>
    %c1_i32_6 = arith.constant 1 : i32
    %13 = vector.broadcast %c1_i32_6 : i32 to vector<8x1xi32>
    %14 = arith.cmpi eq, %8, %13 : vector<8x1xi32>
    %15 = vector.extract_strided_slice %9 {offsets = [1, 0], sizes = [1, 128], strides = [1, 1]} : vector<2x128xf32> to vector<1x128xf32>
    %16 = vector.shape_cast %14 : vector<8x1xi1> to vector<8x1xi1>
    %17 = vector.broadcast %16 : vector<8x1xi1> to vector<8x128xi1>
    %18 = vector.shape_cast %15 : vector<1x128xf32> to vector<1x128xf32>
    %19 = vector.broadcast %18 : vector<1x128xf32> to vector<8x128xf32>
    %20 = arith.select %17, %19, %12 : vector<8x128xi1>, vector<8x128xf32>
    %c8_i32 = arith.constant 8 : i32
    %21 = arith.muli %arg1, %c8_i32 : i32
    %22 = tpu.assume_multiple %21, 8 : i32
    %23 = arith.index_cast %22 : i32 to index
    %c0_7 = arith.constant 0 : index
    %24 = vector.load %arg4[%23, %c0_7] : memref<16x128xf32, #tpu.memory_space<vmem>>, vector<8x128xf32>
    %25 = arith.addf %20, %24 : vector<8x128xf32>
    %c8_i32_8 = arith.constant 8 : i32
    %26 = arith.muli %0, %c8_i32_8 : i32
    %27 = tpu.assume_multiple %26, 8 : i32
    %c0_i32_9 = arith.constant 0 : i32
    %28 = tpu.memref_slice %arg10[%27, %c0_i32_9] : memref<16x128xf32, #tpu.memory_space<vmem>> -> memref<8x128xf32, #tpu.memory_space<vmem>>
    %c0_i32_10 = arith.constant 0 : i32
    %29 = tpu.memref_slice %arg10[%27, %c0_i32_10] : memref<16x128xf32, #tpu.memory_space<vmem>> -> memref<8x128xf32, #tpu.memory_space<vmem>>
    %30 = tpu.memref_slice %arg11[%0] : memref<2x!tpu.dma_semaphore, #tpu.memory_space<semaphore_mem>> -> memref<1x!tpu.dma_semaphore, #tpu.memory_space<semaphore_mem>>
    %31 = tpu.memref_squeeze %30 : memref<1x!tpu.dma_semaphore, #tpu.memory_space<semaphore_mem>> -> memref<!tpu.dma_semaphore, #tpu.memory_space<semaphore_mem>>
    tpu.wait_dma2 semaphore(%31 : memref<!tpu.dma_semaphore, #tpu.memory_space<semaphore_mem>>) src(%28 : memref<8x128xf32, #tpu.memory_space<vmem>>) dst(%29 : memref<8x128xf32, #tpu.memory_space<vmem>>)
    %32 = arith.index_cast %27 : i32 to index
    %c0_11 = arith.constant 0 : index
    %33 = vector.load %arg10[%32, %c0_11] : memref<16x128xf32, #tpu.memory_space<vmem>>, vector<8x128xf32>
    %34 = arith.addf %33, %25 : vector<8x128xf32>
    %cst = arith.constant dense<0.000000e+00> : vector<8xf32>
    %35 = vector.multi_reduction <add>, %34, %cst [1] : vector<8x128xf32> to vector<8xf32>
    %36 = vector.shape_cast %35 : vector<8xf32> to vector<8x1xf32>
    %cst_12 = arith.constant 1.280000e+02 : f32
    %37 = vector.broadcast %cst_12 : f32 to vector<8x1xf32>
    %38 = arith.divf %36, %37 : vector<8x1xf32>
    %39 = vector.broadcast %38 : vector<8x1xf32> to vector<8x128xf32>
    %40 = arith.subf %34, %39 : vector<8x128xf32>
    %41 = arith.mulf %40, %40 : vector<8x128xf32>
    %cst_13 = arith.constant dense<0.000000e+00> : vector<8xf32>
    %42 = vector.multi_reduction <add>, %41, %cst_13 [1] : vector<8x128xf32> to vector<8xf32>
    %43 = vector.shape_cast %42 : vector<8xf32> to vector<8x1xf32>
    %cst_14 = arith.constant 1.280000e+02 : f32
    %44 = vector.broadcast %cst_14 : f32 to vector<8x1xf32>
    %45 = arith.divf %43, %44 : vector<8x1xf32>
    %cst_15 = arith.constant 9.99999996E-13 : f32
    %46 = vector.broadcast %cst_15 : f32 to vector<8x1xf32>
    %47 = arith.addf %45, %46 : vector<8x1xf32>
    %48 = math.rsqrt %47 : vector<8x1xf32>
    %49 = vector.broadcast %48 : vector<8x1xf32> to vector<8x128xf32>
    %50 = arith.mulf %40, %49 : vector<8x128xf32>
    %c0_16 = arith.constant 0 : index
    %c0_17 = arith.constant 0 : index
    %51 = vector.load %arg6[%c0_16, %c0_17] : memref<1x128xf32, #tpu.memory_space<vmem>>, vector<1x128xf32>
    %52 = vector.broadcast %51 : vector<1x128xf32> to vector<8x128xf32>
    %53 = arith.mulf %50, %52 : vector<8x128xf32>
    %c0_18 = arith.constant 0 : index
    %c0_19 = arith.constant 0 : index
    %54 = vector.load %arg7[%c0_18, %c0_19] : memref<1x128xf32, #tpu.memory_space<vmem>>, vector<1x128xf32>
    %55 = vector.broadcast %54 : vector<1x128xf32> to vector<8x128xf32>
    %56 = arith.addf %53, %55 : vector<8x128xf32>
    %c0_20 = arith.constant 0 : index
    %c0_21 = arith.constant 0 : index
    %57 = vector.load %arg9[%c0_20, %c0_21] : memref<8x128xf32, #tpu.memory_space<vmem>>, vector<8x128xf32>
    tpu.vector_store %arg9[%c0_20, %c0_21], %56 {strides = array<i32>} : memref<8x128xf32, #tpu.memory_space<vmem>>, vector<8x128xf32>,
    return
  }
  func.func @transform_0(%arg0: i32, %arg1: i32, %arg2: memref<32xi32, #tpu.memory_space<smem>>) -> (i32, i32) {
    %c2_i32 = arith.constant 2 : i32
    %0 = arith.muli %arg0, %c2_i32 : i32
    %1 = arith.addi %0, %arg1 : i32
    %c0_i32 = arith.constant 0 : i32
    %c0_i32_0 = arith.constant 0 : i32
    return %1, %c0_i32 : i32, i32
  }
  func.func @transform_1(%arg0: i32, %arg1: i32, %arg2: memref<32xi32, #tpu.memory_space<smem>>) -> (i32, i32) {
    %c0_i32 = arith.constant 0 : i32
    %c0_i32_0 = arith.constant 0 : i32
    %c0_i32_1 = arith.constant 0 : i32
    return %c0_i32, %c0_i32_0 : i32, i32
  }
  func.func @transform_2(%arg0: i32, %arg1: i32, %arg2: memref<32xi32, #tpu.memory_space<smem>>) -> (i32, i32) {
    %c0_i32 = arith.constant 0 : i32
    %c0_i32_0 = arith.constant 0 : i32
    %c0_i32_1 = arith.constant 0 : i32
    return %c0_i32, %c0_i32_0 : i32, i32
  }
  func.func @transform_3(%arg0: i32, %arg1: i32, %arg2: memref<32xi32, #tpu.memory_space<smem>>) -> (i32, i32) {
    %c0_i32 = arith.constant 0 : i32
    %c0_i32_0 = arith.constant 0 : i32
    %c0_i32_1 = arith.constant 0 : i32
    return %c0_i32, %c0_i32_0 : i32, i32
  }
  func.func @transform_4(%arg0: i32, %arg1: i32, %arg2: memref<32xi32, #tpu.memory_space<smem>>) -> (i32, i32) {
    %c0_i32 = arith.constant 0 : i32
    %c0_i32_0 = arith.constant 0 : i32
    %c0_i32_1 = arith.constant 0 : i32
    return %c0_i32, %c0_i32_0 : i32, i32
  }
  func.func @transform_6(%arg0: i32, %arg1: i32, %arg2: memref<32xi32, #tpu.memory_space<smem>>) -> (i32, i32) {
    %c2_i32 = arith.constant 2 : i32
    %0 = arith.muli %arg0, %c2_i32 : i32
    %1 = arith.addi %0, %arg1 : i32
    %c0_i32 = arith.constant 0 : i32
    %c0_i32_0 = arith.constant 0 : i32
    return %1, %c0_i32 : i32, i32
  }
}

</mosaic_0001>

<bundles_post_ra>
// kernel: tpu_custom_call.1
= control target key start
LH: loop header
LB: loop body
LE: loop exit
PB: predicated region body
PF: predicated region fallthrough
CT: control target
= control target key end

     0   :  { %s2486_s0 = inlined_call_operand.vmem [shape: s32[32], index: 0, kind: input, shape index: {}]   ;;  %s2487_s1 = inlined_call_operand.vmem [shape: s32[32,1], index: 1, kind: input, shape index: {}]   ;;  %s2488_s2 = inlined_call_operand.vmem [shape: f32[16,128], index: 2, kind: input, shape index: {}]   ;;  %s2489_s3 = inlined_call_operand.vmem [shape: f32[2,128], index: 3, kind: input, shape index: {}]   ;;  %s2490_s4 = inlined_call_operand.vmem [shape: f32[1,128], index: 4, kind: input, shape index: {}]   ;;  %s2491_s5 = inlined_call_operand.vmem [shape: f32[1,128], index: 5, kind: input, shape index: {}]   ;;  %s2492_s6 = inlined_call_operand.hbm [shape: f32[64,128], index: 6, kind: input, shape index: {}]   ;;  %s2493_s7 = inlined_call_operand.hbm [shape: f32[32,128], index: 7, kind: output, shape index: {}]  }
   0x1   :  { %2510 = sst [smem:[#allocation70_spill]] %s2487_s1  ;;  %s12_s26 = sshll.u32 %s2486_s0, 4  ;;  %s13_s26 = int_to_ptr.vmem [resolvable:$true] %s12_s26 }
   0x2   :  { %2511 = sst [smem:[#allocation71_spill]] %s2490_s4  ;;  %s1124_s27 = scalar_lea.vmem %s13_s26, 16 }
   0x3   :  { %2512 = sst [smem:[#allocation72_spill]] %s2491_s5  ;;  %p1125_p0 = scmp.ne.s32.totalorder %s13_s26, %s1124_s27 }
   0x4   :  { %2513 = sst [smem:[#allocation73_spill]] %s2493_s7  ;;  %p1129_p1 = scmp.lt.s32.totalorder %s13_s26, %s13_s26 }
   0x5   :  { %p1130_p2 = scmp.lt.s32.totalorder %s1124_s27, %s1124_s27 }
   0x7   :  { %p1131_p3 = por %p1130_p2, %p1129_p1 }
   0x9   :  { %p1132_p4 = pnand %p1131_p3, %p1125_p0 }
   0xb   :  { %1135 = shalt.err (!%p1132_p4)  }
   0xc   :  { %s1684_s28 = smov [#allocation5]  }
   0xd   :  { %15 = dma.vmem_to_smem %s13_s26, 16, %s1684_s28, [#allocation4] }
   0xe   :  { %1644 = dma.done.wait [#allocation4], 16 }
   0xf   :  { %1645 = vsyncadd [#allocation4], 4294967280 }
  0x10   :  { %17 = sfence }
  0x11   :  { %18 = vsyncpa [#allocation7], 0 }
  0x12   :  { %20 = vsyncpa [#allocation7 + $0x1], 0  ;;  %s1738_s29 = smov 0   ;;  %s1740_s30 = smov 0  }
  0x13   :  { %s1742_s0 = smov 0   ;;  %s1744_s8 = smov 0  }
  0x14   :  { %s1746_s9 = smov 0   ;;  %s1748_s10 = smov 0  }
  0x15   :  { %s1750_s11 = smov 0   ;;  %s1752_s12 = smov 0  }
  0x16 LB: > { %2514 = sst [smem:[#allocation61_spill]] %s1654_s29  ;;  %s822_s13 = sadd.s32 4294967295, %s1682_s12   ;;  %s1682_s12 = sphi %s1752_s12, %s26_s12   ;;  %s1678_s11 = sphi %s1750_s11, %s2560_s11   ;;  %s1674_s10 = sphi %s1748_s10, %s2559_s10   ;;  %s1670_s9 = sphi %s1746_s9, %s2558_s9   ;;  %s1666_s8 = sphi %s1744_s8, %s2557_s8   ;;  %s1662_s0 = sphi %s1742_s0, %s2563_s0   ;;  %s1658_s30 = sphi %s1740_s30, %s2562_s30   ;;  %s1654_s29 = sphi %s1738_s29, %s2561_s29  }
  0x17   : > { %2515 = sst [smem:[#allocation62_spill]] %s1662_s0  ;;  %s35_s14 = sadd.s32 1, %s1674_s10 }
  0x18   : > { %2516 = sst [smem:[#allocation63_spill]] %s1674_s10  ;;  %s38_s15 = sadd.s32 1, %s1678_s11 }
  0x19   : > { %2517 = sst [smem:[#allocation64_spill]] %s1678_s11  ;;  %p36_p5 = scmp.ge.s32.totalorder %s35_s14, 2 }
  0x1a   : > { %2518 = sst [smem:[#allocation65_spill]] %s1682_s12  ;;  %s826_s16 = sshll.u32 %s1678_s11, 1 }
  0x1b   : > { %s823_s17 = sadd.s32 4294967294, %s1682_s12   ;;  %s157_s18 = sadd.s32 %s1674_s10, %s826_s16 }
  0x1c   : > { %s2565_s14 = smov (%p36_p5, %s35_s14), 0  ;;  %s2567_s15 = smov (!%p36_p5, %s38_s15), %s1678_s11 }
  0x1d   : > { %2519 = sst [smem:[#allocation66_spill]] %s2565_s14  ;;  %p173_p6 = scmp.ne.s32.totalorder %s1662_s0, %s1658_s30 }
  0x1e   : > { %p174_p7 = scmp.eq.s32.totalorder %s822_s13, 3  ;;  %p40_p8 = scmp.ge.s32.totalorder %s2567_s15, 2 }
  0x1f   : > { %p179_p9 = scmp.ne.s32.totalorder %s1658_s30, %s1654_s29  ;;  %p180_p11 = scmp.eq.s32.totalorder %s823_s17, 3 }
  0x20   : > { %p1791_p10 = por %p174_p7, %p173_p6  ;;  %s2569_s15 = smov (%p40_p8, %s2567_s15), 0 }
  0x21   : > { %2521 = sst [smem:[#allocation67_spill]] %s2569_s15  ;;  %p1797_p12 = por %p180_p11, %p179_p9 }
  0x22   : > { %s2520_s19 = scalar_select %p1791_p10, 1, 0 }
  0x23   : > { %s2522_s20 = scalar_select %p1797_p12, 1, 0 }
  0x24   : > { %p830_p13 = scmp.ge.s32.totalorder %s1682_s12, 1  ;;  %s827_s21 = sshll.u32 %s2569_s15, 1 }
  0x25   : > { %2523 = sst [smem:[#allocation68_spill]] %s2522_s20  ;;  %p221_p0 = scmp.lt.s32.totalorder %s1682_s12, 5 }
  0x26   : > { %s159_s22 = sadd.s32 %s827_s21, %s2565_s14  ;;  %s163_s23 = sadd.s32 1, %s1662_s0 }
  0x27   : > { %s160_s24 = ssub.s32 %s157_s18, %s159_s22  ;;  %p222_p1 = pnand %p830_p13, %p221_p0 }
  0x28   : > { %p161_p2 = scmp.eq.s32.totalorder %s160_s24, 0  ;;  %s832_s26 = sshll.u32 (!%p222_p1), %s1670_s9, 1  ;;  %v1685_v0 = vmov (!%p222_p1), 0  }
  0x29   : > { %225 = sbr.rel (%p222_p1) target bundleno = 849 (0x351), region = 40  ;;  %s424_s27 = sadd.s32 (!%p222_p1), 1, %s1666_s8  ;;  %1121 = vset.pattern.permute.xlu0 (!%p222_p1), %v1685_v0 }
  0x2a   : > { %s1807_s25 = scalar_select %p161_p2, %s1662_s0, %s163_s23  }
  0x2b   : > { %s1812_s28 = sadd.s32 (!%p222_p1), %s1666_s8, %s832_s26  ;;  %p1815_p4 = scmp.lt.s32.totalorder (!%p222_p1), %s424_s27, 2 }
  0x2c   : > { %2524 = sst [smem:[#allocation69_spill]] %s1807_s25  ;;  %p252_p3 = scmp.lt.s32.totalorder (!%p222_p1), %s1812_s28, 3 }
  0x2d   : > { %s970_s16 = sshll.u32 (!%p222_p1), %s1812_s28, 3  ;;  %s2498_s21 = sand.u32 (!%p222_p1), 1, %s1658_s30  }
  0x2e   : > { %s1821_s18 = sadd.s32 (!%p222_p1), 8, %s970_s16  ;;  %s2526_s1 = sld [smem:[#allocation70_spill]] (!%p222_p1) }
  0x2f   : > { %s1830_s15 = sshll.u32 (!%p222_p1), %s2498_s21, 3  ;;  %p1044_p5 = scmp.eq.s32.totalorder (!%p222_p1), %s1666_s8, 0 }
  0x30   : > { %s2525_s13 = scalar_select %p1815_p4, 1, 0 }
  0x31   : > { %s253_s17 = scalar_select %p252_p3, %s1812_s28, 3 }
  0x32   : > { %s1686_s14 = smov [#allocation2]   ;;  %s1687_s16 = smov [#allocation2 + $0x1]  }
  0x33   : > { %s833_s22 = sshll.u32 %s253_s17, 3  ;;  %s1840_s17 = sshll.u32 %s1670_s9, 4 }
  0x34   : > { %s255_s26 = scalar_lea.vmem %s2526_s1, %s833_s22  ;;  %s280_s11 = sshll.u32 %s1686_s14, 4  ;;  %s1853_s11 = int_to_ptr.vmem [resolvable:$true] %s280_s11 }
  0x35   : > { %v602_v1 = vld [vmem:[%s255_s26] sm:$0xff]  ;;  %s989_s22 = scalar_select %p1044_p5, [#allocation5], [#allocation42] }
  0x36   : > { %vm608_vm0 = vcmp.eq.s32.totalorder %v602_v1, 1  ;;  %s990_s23 = scalar_select %p1044_p5, %s1840_s17, 0 }
  0x37   : > { %v609_v2 = vsel %vm608_vm0, 1, %v1685_v0  ;;  %s284_s26 = sadd.s32 1, %s1840_s17  ;;  %s304_s27 = sadd.s32 2, %s1840_s17 }
  0x38   : > { %611 = vperm.xlu0 %1121, %v609_v2   ;;  %s266_s21 = sld [smem:[%s989_s22 + %s990_s23]]  ;;  %s2571_s26 = smov (!%p1044_p5, %s284_s26), 0 }
  0x39   : > { %s992_s10 = scalar_select %p1044_p5, [#allocation5], [#allocation43] }
  0x3a   : > { %s1858_s1 = sshll.u32 %s1687_s16, 4  ;;  %s2575_s27 = smov (!%p1044_p5, %s304_s27), 0  ;;  %s301_s1 = int_to_ptr.vmem [resolvable:$true] %s1858_s1 }
  0x3b   : > { %s1855_s9 = sld [smem:[%s992_s10 + %s2571_s26]]  ;;  %s1688_s16 = smov [#allocation2 + $0x2]  }
  0x3c   : > { %s995_s22 = scalar_select %p1044_p5, [#allocation5], [#allocation44] }
  0x3d   : > { %s320_s25 = sshll.u32 %s1688_s16, 4  ;;  %s1876_s12 = scalar_lea.hbm %s2492_s6, 1024  ;;  %s1899_s25 = int_to_ptr.vmem [resolvable:$true] %s320_s25 }
  0x3e   : > { %p267_p6 = scmp.gt.s32.totalorder %s266_s21, 0  ;;  %p836_p7 = scmp.lt.s32.totalorder %s266_s21, 63 }
  0x3f   : > { %s1866_s10 = sld [smem:[%s995_s22 + %s2575_s27]] }
  0x40   : > { %s2573_s21 = smov (!%p267_p6, %s266_s21), 0 }
  0x41   : > { %s2577_s21 = smov (!%p836_p7, %s2573_s21), 63 }
  0x42   : > { %s841_s14 = sshll.u32 %s2577_s21, 4 }
  0x43   : > { %s272_s24 = scalar_lea.hbm %s2492_s6, %s841_s14 }
  0x44   : > { %s1136_s0 = scalar_lea.hbm %s272_s24, 16  ;;  %p1141_p1 = scmp.lt.u32.totalorder %s272_s24, %s2492_s6 }
  0x45   : > { %p1137_p11 = scmp.ne.s32.totalorder %s272_s24, %s1136_s0  ;;  %p1142_p2 = scmp.lt.u32.totalorder %s1876_s12, %s1136_s0 }
  0x46   : > { %p1144_p6 = scmp.lt.u32.totalorder %s1136_s0, %s272_s24 }
  0x47   : > { %p1138_p13 = pnand %p1137_p11, %p1044_p5  ;;  %p1143_p3 = por %p1142_p2, %p1141_p1 }
  0x49   : > { %p1139_p0 = pneg %p1138_p13  ;;  %p1145_p7 = por %p1144_p6, %p1143_p3 }
  0x4b   : > { %p1146_p9 = pnand %p1145_p7, %p1139_p0 }
  0x4d   : > { %1149 = shalt.err (!%p1146_p9)  }
  0x4e   : > { %s1150_s27 = scalar_lea.vmem %s1853_s11, 16  ;;  %s1887_s29 = scalar_lea.vmem %s1853_s11, 256 }
  0x4f   : > { %p1151_p11 = scmp.ne.s32.totalorder %s1853_s11, %s1150_s27  ;;  %p1157_p12 = scmp.lt.s32.totalorder %s1853_s11, %s1853_s11 }
  0x50   : > { %p1158_p1 = scmp.lt.s32.totalorder %s1887_s29, %s1150_s27 }
  0x51   : > { %p1152_p13 = pnand %p1151_p11, %p1044_p5 }
  0x52   : > { %p1159_p2 = por %p1158_p1, %p1157_p12 }
  0x53   : > { %p1153_p8 = pneg %p1152_p13 }
  0x55   : > { %p1160_p3 = pnand %p1159_p2, %p1153_p8 }
  0x57   : > { %1163 = shalt.err (!%p1160_p3)  }
  0x58   : > { %991 = dma.hbm_to_vmem [thread:$0]  (%p1044_p5), %s272_s24, 16, %s1853_s11, [#allocation3] }
  0x59   : > { %p2527_p9 = scmp.gt.s32.totalorder %s1855_s9, 0  ;;  %p2528_p12 = scmp.lt.s32.totalorder %s1855_s9, 63 }
  0x5a   : > { %s324_s0 = sadd.s32 3, %s1840_s17 }
  0x5b   : > { %s287_s7 = scalar_select %p2527_p9, %s1855_s9, 0 }
  0x5d   : > { %s2579_s7 = smov (!%p2528_p12, %s287_s7), 63 }
  0x5e   : > { %s847_s20 = sshll.u32 %s2579_s7, 4 }
  0x5f   : > { %s291_s23 = scalar_lea.hbm %s2492_s6, %s847_s20 }
  0x60   : > { %s1164_s26 = scalar_lea.hbm %s291_s23, 16  ;;  %p1169_p13 = scmp.lt.u32.totalorder %s291_s23, %s2492_s6 }
  0x61   : > { %p1165_p6 = scmp.ne.s32.totalorder %s291_s23, %s1164_s26  ;;  %p1170_p1 = scmp.lt.u32.totalorder %s1876_s12, %s1164_s26 }
  0x62   : > { %p1172_p3 = scmp.lt.u32.totalorder %s1164_s26, %s291_s23 }
  0x63   : > { %p1166_p7 = pnand %p1165_p6, %p1044_p5  ;;  %p1171_p2 = por %p1170_p1, %p1169_p13 }
  0x65   : > { %p1167_p11 = pneg %p1166_p7  ;;  %p1173_p9 = por %p1172_p3, %p1171_p2 }
  0x67   : > { %p1174_p12 = pnand %p1173_p9, %p1167_p11 }
  0x69   : > { %1177 = shalt.err (!%p1174_p12)  }
  0x6a   : > { %s1178_s9 = scalar_lea.vmem %s301_s1, 16  ;;  %p1185_p6 = scmp.lt.s32.totalorder %s301_s1, %s1853_s11 }
  0x6b   : > { %p1179_p0 = scmp.ne.s32.totalorder %s301_s1, %s1178_s9  ;;  %p1186_p7 = scmp.lt.s32.totalorder %s1887_s29, %s1178_s9 }
  0x6d   : > { %p1180_p8 = pnand %p1179_p0, %p1044_p5  ;;  %p1187_p4 = por %p1186_p7, %p1185_p6 }
  0x6f   : > { %p1181_p10 = pneg %p1180_p8 }
  0x71   : > { %p1188_p1 = pnand %p1187_p4, %p1181_p10 }
  0x73   : > { %1191 = shalt.err (!%p1188_p1)  }
  0x74   : > { %994 = dma.hbm_to_vmem [thread:$0]  (%p1044_p5), %s291_s23, 16, %s301_s1, [#allocation3] }
  0x75   : > { %p2529_p11 = scmp.gt.s32.totalorder %s1866_s10, 0  ;;  %p2530_p8 = scmp.lt.s32.totalorder %s1866_s10, 63 }
  0x76   : > { %s998_s27 = scalar_select %p1044_p5, [#allocation5], [#allocation45] }
  0x77   : > { %s307_s21 = scalar_select %p2529_p11, %s1866_s10, 0 }
  0x78   : > { %s2583_s0 = smov (!%p1044_p5, %s324_s0), 0  ;;  %s1689_s20 = smov [#allocation2 + $0x3]  }
  0x79   : > { %s2581_s21 = smov (!%p2530_p8, %s307_s21), 63  ;;  %s340_s22 = sshll.u32 %s1689_s20, 4  ;;  %s1956_s22 = int_to_ptr.vmem [resolvable:$true] %s340_s22 }
  0x7a   : > { %s853_s7 = sshll.u32 %s2581_s21, 4  ;;  %s1933_s16 = sld [smem:[%s998_s27 + %s2583_s0]] }
  0x7b   : > { %s311_s24 = scalar_lea.hbm %s2492_s6, %s853_s7 }
  0x7c   : > { %s1192_s9 = scalar_lea.hbm %s311_s24, 16  ;;  %p1197_p13 = scmp.lt.u32.totalorder %s311_s24, %s2492_s6 }
  0x7d   : > { %p1193_p10 = scmp.ne.s32.totalorder %s311_s24, %s1192_s9  ;;  %p1198_p2 = scmp.lt.u32.totalorder %s1876_s12, %s1192_s9 }
  0x7e   : > { %p1200_p9 = scmp.lt.u32.totalorder %s1192_s9, %s311_s24 }
  0x7f   : > { %p1194_p4 = pnand %p1193_p10, %p1044_p5  ;;  %p1199_p3 = por %p1198_p2, %p1197_p13 }
  0x81   : > { %p1195_p0 = pneg %p1194_p4  ;;  %p1201_p12 = por %p1200_p9, %p1199_p3 }
  0x83   : > { %p1202_p6 = pnand %p1201_p12, %p1195_p0 }
  0x85   : > { %1205 = shalt.err (!%p1202_p6)  }
  0x86   : > { %s1206_s10 = scalar_lea.vmem %s1899_s25, 16  ;;  %p1213_p8 = scmp.lt.s32.totalorder %s1899_s25, %s1853_s11 }
  0x87   : > { %p1207_p7 = scmp.ne.s32.totalorder %s1899_s25, %s1206_s10  ;;  %p1214_p10 = scmp.lt.s32.totalorder %s1887_s29, %s1206_s10 }
  0x89   : > { %p1208_p1 = pnand %p1207_p7, %p1044_p5  ;;  %p1215_p4 = por %p1214_p10, %p1213_p8 }
  0x8b   : > { %p1209_p11 = pneg %p1208_p1 }
  0x8d   : > { %p1216_p2 = pnand %p1215_p4, %p1209_p11 }
  0x8f   : > { %1219 = shalt.err (!%p1216_p2)  }
  0x90   : > { %997 = dma.hbm_to_vmem [thread:$0]  (%p1044_p5), %s311_s24, 16, %s1899_s25, [#allocation3] }
  0x91   : > { %s344_s0 = sadd.s32 4, %s1840_s17  ;;  %s1690_s27 = smov [#allocation2 + $0x4]  }
  0x92   : > { %s1001_s21 = scalar_select %p1044_p5, [#allocation5], [#allocation46] }
  0x93   : > { %s2585_s0 = smov (!%p1044_p5, %s344_s0), 0  ;;  %s1958_s7 = sshll.u32 %s1690_s27, 4  ;;  %s361_s7 = int_to_ptr.vmem [resolvable:$true] %s1958_s7 }
  0x94   : > { %p326_p0 = scmp.gt.s32.totalorder %s1933_s16, 0  ;;  %p854_p13 = scmp.lt.s32.totalorder %s1933_s16, 63 }
  0x95   : > { %s1962_s20 = sld [smem:[%s1001_s21 + %s2585_s0]]  ;;  %s364_s14 = sadd.s32 5, %s1840_s17 }
  0x96   : > { %s2587_s16 = smov (!%p326_p0, %s1933_s16), 0  ;;  %s2591_s14 = smov (!%p1044_p5, %s364_s14), 0 }
  0x97   : > { %s1968_s25 = scalar_select %p1044_p5, [#allocation5], [#allocation47] }
  0x98   : > { %s2589_s16 = smov (!%p854_p13, %s2587_s16), 63 }
  0x99   : > { %s859_s26 = sshll.u32 %s2589_s16, 4 }
  0x9a   : > { %s331_s1 = scalar_lea.hbm %s2492_s6, %s859_s26 }
  0x9b   : > { %s1220_s23 = scalar_lea.hbm %s331_s1, 16  ;;  %p1225_p7 = scmp.lt.u32.totalorder %s331_s1, %s2492_s6 }
  0x9c   : > { %p1221_p9 = scmp.ne.s32.totalorder %s331_s1, %s1220_s23  ;;  %p1226_p1 = scmp.lt.u32.totalorder %s1876_s12, %s1220_s23 }
  0x9d   : > { %p1228_p8 = scmp.lt.u32.totalorder %s1220_s23, %s331_s1 }
  0x9e   : > { %p1222_p12 = pnand %p1221_p9, %p1044_p5  ;;  %p1227_p11 = por %p1226_p1, %p1225_p7 }
  0xa0   : > { %p1223_p6 = pneg %p1222_p12  ;;  %p1229_p10 = por %p1228_p8, %p1227_p11 }
  0xa2   : > { %p1230_p4 = pnand %p1229_p10, %p1223_p6 }
  0xa4   : > { %1233 = shalt.err (!%p1230_p4)  }
  0xa5   : > { %s1234_s16 = scalar_lea.vmem %s1956_s22, 16  ;;  %p1241_p9 = scmp.lt.s32.totalorder %s1956_s22, %s1853_s11 }
  0xa6   : > { %p1235_p2 = scmp.ne.s32.totalorder %s1956_s22, %s1234_s16  ;;  %p1242_p12 = scmp.lt.s32.totalorder %s1887_s29, %s1234_s16 }
  0xa8   : > { %p1236_p0 = pnand %p1235_p2, %p1044_p5  ;;  %p1243_p3 = por %p1242_p12, %p1241_p9 }
  0xaa   : > { %p1237_p13 = pneg %p1236_p0 }
  0xac   : > { %p1244_p1 = pnand %p1243_p3, %p1237_p13 }
  0xae   : > { %1247 = shalt.err (!%p1244_p1)  }
  0xaf   : > { %1000 = dma.hbm_to_vmem [thread:$0]  (%p1044_p5), %s331_s1, 16, %s1956_s22, [#allocation3] }
  0xb0   : > { %p2531_p6 = scmp.gt.s32.totalorder %s1962_s20, 0  ;;  %p860_p7 = scmp.lt.s32.totalorder %s1962_s20, 63 }
  0xb1   : > { %s1997_s27 = sld [smem:[%s1968_s25 + %s2591_s14]]  ;;  %s1691_s24 = smov [#allocation2 + $0x5]  }
  0xb2   : > { %s347_s21 = scalar_select %p2531_p6, %s1962_s20, 0 }
  0xb3   : > { %s380_s9 = sshll.u32 %s1691_s24, 4  ;;  %s384_s23 = sadd.s32 6, %s1840_s17  ;;  %s2002_s9 = int_to_ptr.vmem [resolvable:$true] %s380_s9 }
  0xb4   : > { %s2593_s21 = smov (!%p860_p7, %s347_s21), 63 }
  0xb5   : > { %s865_s10 = sshll.u32 %s2593_s21, 4 }
  0xb6   : > { %s351_s5 = scalar_lea.hbm %s2492_s6, %s865_s10 }
  0xb7   : > { %s1248_s22 = scalar_lea.hbm %s351_s5, 16  ;;  %p1253_p10 = scmp.lt.u32.totalorder %s351_s5, %s2492_s6 }
  0xb8   : > { %p1249_p3 = scmp.ne.s32.totalorder %s351_s5, %s1248_s22  ;;  %p1254_p4 = scmp.lt.u32.totalorder %s1876_s12, %s1248_s22 }
  0xb9   : > { %p1256_p0 = scmp.lt.u32.totalorder %s1248_s22, %s351_s5 }
  0xba   : > { %p1250_p11 = pnand %p1249_p3, %p1044_p5  ;;  %p1255_p2 = por %p1254_p4, %p1253_p10 }
  0xbc   : > { %p1251_p8 = pneg %p1250_p11  ;;  %p1257_p13 = por %p1256_p0, %p1255_p2 }
  0xbe   : > { %p1258_p9 = pnand %p1257_p13, %p1251_p8 }
  0xc0   : > { %1261 = shalt.err (!%p1258_p9)  }
  0xc1   : > { %s1262_s25 = scalar_lea.vmem %s361_s7, 16  ;;  %p1269_p7 = scmp.lt.s32.totalorder %s361_s7, %s1853_s11 }
  0xc2   : > { %p1263_p12 = scmp.ne.s32.totalorder %s361_s7, %s1262_s25  ;;  %p1270_p3 = scmp.lt.s32.totalorder %s1887_s29, %s1262_s25 }
  0xc4   : > { %p1264_p1 = pnand %p1263_p12, %p1044_p5  ;;  %p1271_p11 = por %p1270_p3, %p1269_p7 }
  0xc6   : > { %p1265_p6 = pneg %p1264_p1 }
  0xc8   : > { %p1272_p4 = pnand %p1271_p11, %p1265_p6 }
  0xca   : > { %1275 = shalt.err (!%p1272_p4)  }
  0xcb   : > { %1003 = dma.hbm_to_vmem [thread:$0]  (%p1044_p5), %s351_s5, 16, %s361_s7, [#allocation3] }
  0xcc   : > { %p366_p8 = scmp.gt.s32.totalorder %s1997_s27, 0  ;;  %p866_p10 = scmp.lt.s32.totalorder %s1997_s27, 63 }
  0xcd   : > { %s1007_s1 = scalar_select %p1044_p5, [#allocation5], [#allocation48] }
  0xce   : > { %s2595_s27 = smov (!%p366_p8, %s1997_s27), 0  ;;  %s2597_s23 = smov (!%p1044_p5, %s384_s23), 0 }
  0xcf   : > { %s2599_s27 = smov (!%p866_p10, %s2595_s27), 63  ;;  %s2026_s21 = sld [smem:[%s1007_s1 + %s2597_s23]] }
  0xd0   : > { %s1692_s24 = smov [#allocation2 + $0x6]   ;;  %s871_s0 = sshll.u32 %s2599_s27, 4 }
  0xd1   : > { %s2028_s10 = sshll.u32 %s1692_s24, 4  ;;  %s404_s16 = sadd.s32 7, %s1840_s17  ;;  %s2060_s10 = int_to_ptr.vmem [resolvable:$true] %s2028_s10 }
  0xd2   : > { %s371_s5 = scalar_lea.hbm %s2492_s6, %s871_s0 }
  0xd3   : > { %s1276_s7 = scalar_lea.hbm %s371_s5, 16  ;;  %p1281_p9 = scmp.lt.u32.totalorder %s371_s5, %s2492_s6 }
  0xd4   : > { %p1277_p2 = scmp.ne.s32.totalorder %s371_s5, %s1276_s7  ;;  %p1282_p12 = scmp.lt.u32.totalorder %s1876_s12, %s1276_s7 }
  0xd5   : > { %p1284_p6 = scmp.lt.u32.totalorder %s1276_s7, %s371_s5 }
  0xd6   : > { %p1278_p0 = pnand %p1277_p2, %p1044_p5  ;;  %p1283_p1 = por %p1282_p12, %p1281_p9 }
  0xd8   : > { %p1279_p13 = pneg %p1278_p0  ;;  %p1285_p7 = por %p1284_p6, %p1283_p1 }
  0xda   : > { %p1286_p3 = pnand %p1285_p7, %p1279_p13 }
  0xdc   : > { %1289 = shalt.err (!%p1286_p3)  }
  0xdd   : > { %s1290_s17 = scalar_lea.vmem %s2002_s9, 16  ;;  %p1297_p10 = scmp.lt.s32.totalorder %s2002_s9, %s1853_s11 }
  0xde   : > { %p1291_p11 = scmp.ne.s32.totalorder %s2002_s9, %s1290_s17  ;;  %p1298_p2 = scmp.lt.s32.totalorder %s1887_s29, %s1290_s17 }
  0xe0   : > { %p1292_p4 = pnand %p1291_p11, %p1044_p5  ;;  %p1299_p0 = por %p1298_p2, %p1297_p10 }
  0xe2   : > { %p1293_p8 = pneg %p1292_p4 }
  0xe4   : > { %p1300_p9 = pnand %p1299_p0, %p1293_p8 }
  0xe6   : > { %1303 = shalt.err (!%p1300_p9)  }
  0xe7   : > { %1006 = dma.hbm_to_vmem [thread:$0]  (%p1044_p5), %s371_s5, 16, %s2002_s9, [#allocation3] }
  0xe8   : > { %s1010_s27 = scalar_select %p1044_p5, [#allocation5], [#allocation49] }
  0xe9   : > { %s2601_s16 = smov (!%p1044_p5, %s404_s16), 0  ;;  %p386_p13 = scmp.gt.s32.totalorder %s2026_s21, 0 }
  0xea   : > { %p872_p12 = scmp.lt.s32.totalorder %s2026_s21, 63  ;;  %s2056_s23 = sld [smem:[%s1010_s27 + %s2601_s16]] }
  0xeb   : > { %s1693_s1 = smov [#allocation2 + $0x7]   ;;  %s2603_s21 = smov (!%p386_p13, %s2026_s21), 0 }
  0xec   : > { %s420_s24 = sshll.u32 %s1693_s1, 4  ;;  %s2063_s0 = sand.u32 1, %s1666_s8  ;;  %s2065_s24 = int_to_ptr.vmem [resolvable:$true] %s420_s24 }
  0xed   : > { %s2605_s21 = smov (!%p872_p12, %s2603_s21), 63  ;;  %s2508_s9 = ssub.s32 1, %s2063_s0 }
  0xee   : > { %s877_s22 = sshll.u32 %s2605_s21, 4  ;;  %s2070_s20 = sshll.u32 %s2508_s9, 3 }
  0xef   : > { %s391_s7 = scalar_lea.hbm %s2492_s6, %s877_s22 }
  0xf0   : > { %s1304_s14 = scalar_lea.hbm %s391_s7, 16  ;;  %p1309_p11 = scmp.lt.u32.totalorder %s391_s7, %s2492_s6 }
  0xf1   : > { %p1305_p6 = scmp.ne.s32.totalorder %s391_s7, %s1304_s14  ;;  %p1310_p4 = scmp.lt.u32.totalorder %s1876_s12, %s1304_s14 }
  0xf2   : > { %p1312_p10 = scmp.lt.u32.totalorder %s1304_s14, %s391_s7 }
  0xf3   : > { %p1306_p7 = pnand %p1305_p6, %p1044_p5  ;;  %p1311_p8 = por %p1310_p4, %p1309_p11 }
  0xf5   : > { %p1307_p3 = pneg %p1306_p7  ;;  %p1313_p2 = por %p1312_p10, %p1311_p8 }
  0xf7   : > { %p1314_p0 = pnand %p1313_p2, %p1307_p3 }
  0xf9   : > { %1317 = shalt.err (!%p1314_p0)  }
  0xfa   : > { %s1318_s21 = scalar_lea.vmem %s2060_s10, 16  ;;  %p1325_p6 = scmp.lt.s32.totalorder %s2060_s10, %s1853_s11 }
  0xfb   : > { %p1319_p9 = scmp.ne.s32.totalorder %s2060_s10, %s1318_s21  ;;  %p1326_p7 = scmp.lt.s32.totalorder %s1887_s29, %s1318_s21 }
  0xfd   : > { %p1320_p13 = pnand %p1319_p9, %p1044_p5  ;;  %p1327_p1 = por %p1326_p7, %p1325_p6 }
  0xff   : > { %p1321_p12 = pneg %p1320_p13 }
 0x101   : > { %p1328_p4 = pnand %p1327_p1, %p1321_p12 }
 0x103   : > { %1331 = shalt.err (!%p1328_p4)  }
 0x104   : > { %1009 = dma.hbm_to_vmem [thread:$0]  (%p1044_p5), %s391_s7, 16, %s2060_s10, [#allocation3] }
 0x105   : > { %p2532_p3 = scmp.gt.s32.totalorder %s2056_s23, 0  ;;  %p878_p11 = scmp.lt.s32.totalorder %s2056_s23, 63 }
 0x106   : > { %p2533_p8 = scmp.ne.s32.totalorder %s2525_s13, 0  ;;  %s2109_s26 = scalar_lea.vmem [#allocation2], %s2070_s20 }
 0x107   : > { %s407_s27 = scalar_select %p2532_p3, %s2056_s23, 0 }
 0x108   : > { %s1014_s1 = scalar_select %p2533_p8, [#allocation5], [#allocation50] }
 0x109   : > { %s2607_s27 = smov (!%p878_p11, %s407_s27), 63  ;;  %s451_s10 = sshll.u32 %s2109_s26, 4  ;;  %s452_s10 = int_to_ptr.vmem [resolvable:$true] %s451_s10 }
 0x10a   : > { %s2534_s22 = scalar_select %p2533_p8, %s1821_s18, 0 }
 0x10b   : > { %s883_s14 = sshll.u32 %s2607_s27, 4 }
 0x10c   : > { %s2102_s16 = sld [smem:[%s1014_s1 + %s2534_s22]]  ;;  %s411_s21 = scalar_lea.hbm %s2492_s6, %s883_s14 }
 0x10d   : > { %s1332_s7 = scalar_lea.hbm %s411_s21, 16  ;;  %p1337_p0 = scmp.lt.u32.totalorder %s411_s21, %s2492_s6 }
 0x10e   : > { %p1333_p1 = scmp.ne.s32.totalorder %s411_s21, %s1332_s7  ;;  %p1338_p9 = scmp.lt.u32.totalorder %s1876_s12, %s1332_s7 }
 0x10f   : > { %p1340_p12 = scmp.lt.u32.totalorder %s1332_s7, %s411_s21 }
 0x110   : > { %p1334_p10 = pnand %p1333_p1, %p1044_p5  ;;  %p1339_p13 = por %p1338_p9, %p1337_p0 }
 0x112   : > { %p1335_p2 = pneg %p1334_p10  ;;  %p1341_p6 = por %p1340_p12, %p1339_p13 }
 0x114   : > { %p1342_p7 = pnand %p1341_p6, %p1335_p2 }
 0x116   : > { %1345 = shalt.err (!%p1342_p7)  }
 0x117   : > { %s1346_s20 = scalar_lea.vmem %s2065_s24, 16  ;;  %p1353_p1 = scmp.lt.s32.totalorder %s2065_s24, %s1853_s11 }
 0x118   : > { %p1347_p4 = scmp.ne.s32.totalorder %s2065_s24, %s1346_s20  ;;  %p1354_p10 = scmp.lt.s32.totalorder %s1887_s29, %s1346_s20 }
 0x11a   : > { %p1348_p3 = pnand %p1347_p4, %p1044_p5  ;;  %p1355_p8 = por %p1354_p10, %p1353_p1 }
 0x11c   : > { %p1349_p11 = pneg %p1348_p3 }
 0x11e   : > { %p1356_p0 = pnand %p1355_p8, %p1349_p11 }
 0x120   : > { %1359 = shalt.err (!%p1356_p0)  }
 0x121   : > { %1012 = dma.hbm_to_vmem [thread:$0]  (%p1044_p5), %s411_s21, 16, %s2065_s24, [#allocation3] }
 0x122   : > { %p2535_p2 = scmp.ne.s32.totalorder %s2525_s13, 0  ;;  %p436_p9 = scmp.gt.s32.totalorder %s2102_s16, 0 }
 0x123   : > { %p888_p8 = scmp.lt.s32.totalorder %s2102_s16, 63  ;;  %s2536_s27 = sadd.s32 1, %s1821_s18 }
 0x124   : > { %s1017_s9 = scalar_select %p2535_p2, [#allocation5], [#allocation51] }
 0x125   : > { %s2609_s27 = smov (!%p2535_p2, %s2536_s27), 0  ;;  %s2611_s16 = smov (!%p436_p9, %s2102_s16), 0 }
 0x126   : > { %s2137_s1 = sld [smem:[%s1017_s9 + %s2609_s27]]  ;;  %s744_s22 = scalar_lea.vmem %s2109_s26, 1 [#allocation2] }
 0x127   : > { %s2613_s16 = smov (!%p888_p8, %s2611_s16), 63  ;;  %s749_s14 = scalar_lea.vmem %s2109_s26, 2 [#allocation2] }
 0x128   : > { %s893_s25 = sshll.u32 %s2613_s16, 4  ;;  %s2143_s17 = sshll.u32 %s744_s22, 4  ;;  %s473_s17 = int_to_ptr.vmem [resolvable:$true] %s2143_s17 }
 0x129   : > { %s441_s7 = scalar_lea.hbm %s2492_s6, %s893_s25  ;;  %s2148_s23 = sshll.u32 %s749_s14, 4  ;;  %s2180_s23 = int_to_ptr.vmem [resolvable:$true] %s2148_s23 }
 0x12a   : > { %s2537_s20 = ssub.s32 1, %s2063_s0  ;;  %s1360_s4 = scalar_lea.hbm %s441_s7, 16 }
 0x12b   : > { %s2152_s5 = scalar_lea.sflag [#allocation3], %s2537_s20  ;;  %p1361_p5 = scmp.ne.s32.totalorder %s441_s7, %s1360_s4 }
 0x12c   : > { %p1365_p6 = scmp.lt.u32.totalorder %s441_s7, %s2492_s6  ;;  %p1366_p7 = scmp.lt.u32.totalorder %s1876_s12, %s1360_s4 }
 0x12d   : > { %p1362_p13 = pnand %p1361_p5, %p2535_p2  ;;  %p1368_p3 = scmp.lt.u32.totalorder %s1360_s4, %s441_s7 }
 0x12e   : > { %p1367_p4 = por %p1366_p7, %p1365_p6 }
 0x12f   : > { %p1363_p12 = pneg %p1362_p13 }
 0x130   : > { %p1369_p11 = por %p1368_p3, %p1367_p4 }
 0x132   : > { %p1370_p1 = pnand %p1369_p11, %p1363_p12 }
 0x134   : > { %1373 = shalt.err (!%p1370_p1)  }
 0x135   : > { %s1374_s16 = scalar_lea.vmem %s452_s10, 16  ;;  %p1381_p8 = scmp.lt.s32.totalorder %s452_s10, %s1853_s11 }
 0x136   : > { %p1375_p10 = scmp.ne.s32.totalorder %s452_s10, %s1374_s16  ;;  %p1382_p5 = scmp.lt.s32.totalorder %s1887_s29, %s1374_s16 }
 0x138   : > { %p1376_p0 = pnand %p1375_p10, %p2535_p2  ;;  %p1383_p13 = por %p1382_p5, %p1381_p8 }
 0x13a   : > { %p1377_p9 = pneg %p1376_p0 }
 0x13c   : > { %p1384_p6 = pnand %p1383_p13, %p1377_p9 }
 0x13e   : > { %1387 = shalt.err (!%p1384_p6)  }
 0x13f   : > { %1016 = dma.hbm_to_vmem [thread:$0]  (%p2535_p2), %s441_s7, 16, %s452_s10, %s2152_s5 }
 0x140   : > { %p457_p12 = scmp.gt.s32.totalorder %s2137_s1, 0  ;;  %p894_p7 = scmp.lt.s32.totalorder %s2137_s1, 63 }
 0x141   : > { %s1020_s4 = scalar_select %p2535_p2, [#allocation5], [#allocation52] }
 0x142   : > { %s2615_s1 = smov (!%p457_p12, %s2137_s1), 0  ;;  %s2538_s22 = sadd.s32 2, %s1821_s18 }
 0x143   : > { %s2617_s22 = smov (!%p2535_p2, %s2538_s22), 0  ;;  %s2619_s1 = smov (!%p894_p7, %s2615_s1), 63 }
 0x144   : > { %s2177_s14 = sld [smem:[%s1020_s4 + %s2617_s22]]  ;;  %s899_s25 = sshll.u32 %s2619_s1, 4 }
 0x145   : > { %s463_s10 = scalar_lea.hbm %s2492_s6, %s899_s25  ;;  %s754_s7 = scalar_lea.vmem %s2109_s26, 3 [#allocation2] }
 0x146   : > { %s1388_s20 = scalar_lea.hbm %s463_s10, 16  ;;  %p1393_p1 = scmp.lt.u32.totalorder %s463_s10, %s2492_s6 }
 0x147   : > { %p1389_p4 = scmp.ne.s32.totalorder %s463_s10, %s1388_s20  ;;  %p1394_p10 = scmp.lt.u32.totalorder %s1876_s12, %s1388_s20 }
 0x148   : > { %p1396_p9 = scmp.lt.u32.totalorder %s1388_s20, %s463_s10 }
 0x149   : > { %p1390_p3 = pnand %p1389_p4, %p2535_p2  ;;  %p1395_p0 = por %p1394_p10, %p1393_p1 }
 0x14b   : > { %p1391_p11 = pneg %p1390_p3  ;;  %p1397_p8 = por %p1396_p9, %p1395_p0 }
 0x14d   : > { %p1398_p5 = pnand %p1397_p8, %p1391_p11 }
 0x14f   : > { %1401 = shalt.err (!%p1398_p5)  }
 0x150   : > { %s1402_s1 = scalar_lea.vmem %s473_s17, 16  ;;  %p1409_p7 = scmp.lt.s32.totalorder %s473_s17, %s1853_s11 }
 0x151   : > { %p1403_p13 = scmp.ne.s32.totalorder %s473_s17, %s1402_s1  ;;  %p1410_p4 = scmp.lt.s32.totalorder %s1887_s29, %s1402_s1 }
 0x153   : > { %p1404_p6 = pnand %p1403_p13, %p2535_p2  ;;  %p1411_p3 = por %p1410_p4, %p1409_p7 }
 0x155   : > { %p1405_p12 = pneg %p1404_p6 }
 0x157   : > { %p1412_p1 = pnand %p1411_p3, %p1405_p12 }
 0x159   : > { %1415 = shalt.err (!%p1412_p1)  }
 0x15a   : > { %1019 = dma.hbm_to_vmem [thread:$0]  (%p2535_p2), %s463_s10, 16, %s473_s17, %s2152_s5  ;;  %v604_v3 = vlaneseq }
 0x15b   : > { %s1023_s16 = scalar_select %p2535_p2, [#allocation5], [#allocation53] }
 0x15c   : > { %s2539_s4 = sadd.s32 3, %s1821_s18  ;;  %p478_p11 = scmp.gt.s32.totalorder %s2177_s14, 0 }
 0x15d   : > { %s2621_s4 = smov (!%p2535_p2, %s2539_s4), 0  ;;  %p901_p10 = scmp.lt.s32.totalorder %s2177_s14, 63 }
 0x15e   : > { %s2207_s22 = sld [smem:[%s1023_s16 + %s2621_s4]]  ;;  %s2209_s25 = sshll.u32 %s754_s7, 4  ;;  %s2253_s25 = int_to_ptr.vmem [resolvable:$true] %s2209_s25 }
 0x15f   : > { %s2623_s14 = smov (!%p478_p11, %s2177_s14), 0  ;;  %s2540_s21 = sadd.s32 4, %s1821_s18 }
 0x160   : > { %s1026_s24 = scalar_select %p2535_p2, [#allocation5], [#allocation54] }
 0x161   : > { %s2625_s14 = smov (!%p901_p10, %s2623_s14), 63  ;;  %s2627_s21 = smov (!%p2535_p2, %s2540_s21), 0 }
 0x162   : > { %s906_s17 = sshll.u32 %s2625_s14, 4  ;;  %s759_s10 = scalar_lea.vmem %s2109_s26, 4 [#allocation2] }
 0x163   : > { %s484_s27 = scalar_lea.hbm %s2492_s6, %s906_s17 }
 0x164   : > { %s1416_s1 = scalar_lea.hbm %s484_s27, 16  ;;  %p1421_p13 = scmp.lt.u32.totalorder %s484_s27, %s2492_s6 }
 0x165   : > { %p1417_p9 = scmp.ne.s32.totalorder %s484_s27, %s1416_s1  ;;  %p1422_p6 = scmp.lt.u32.totalorder %s1876_s12, %s1416_s1 }
 0x166   : > { %p1424_p7 = scmp.lt.u32.totalorder %s1416_s1, %s484_s27 }
 0x167   : > { %p1418_p8 = pnand %p1417_p9, %p2535_p2  ;;  %p1423_p12 = por %p1422_p6, %p1421_p13 }
 0x169   : > { %p1419_p5 = pneg %p1418_p8  ;;  %p1425_p4 = por %p1424_p7, %p1423_p12 }
 0x16b   : > { %p1426_p3 = pnand %p1425_p4, %p1419_p5 }
 0x16d   : > { %1429 = shalt.err (!%p1426_p3)  }
 0x16e   : > { %s1430_s14 = scalar_lea.vmem %s2180_s23, 16  ;;  %p1437_p9 = scmp.lt.s32.totalorder %s2180_s23, %s1853_s11 }
 0x16f   : > { %p1431_p1 = scmp.ne.s32.totalorder %s2180_s23, %s1430_s14  ;;  %p1438_p8 = scmp.lt.s32.totalorder %s1887_s29, %s1430_s14 }
 0x171   : > { %p1432_p11 = pnand %p1431_p1, %p2535_p2  ;;  %p1439_p0 = por %p1438_p8, %p1437_p9 }
 0x173   : > { %p1433_p10 = pneg %p1432_p11 }
 0x175   : > { %p1440_p6 = pnand %p1439_p0, %p1433_p10 }
 0x177   : > { %1443 = shalt.err (!%p1440_p6)  }
 0x178   : > { %1022 = dma.hbm_to_vmem [thread:$0]  (%p2535_p2), %s484_s27, 16, %s2180_s23, %s2152_s5  ;;  %v605_v4 = vshrl.u32 %v604_v3, 7 }
 0x179   : > { %p2541_p5 = scmp.gt.s32.totalorder %s2207_s22, 0  ;;  %p908_p13 = scmp.lt.s32.totalorder %s2207_s22, 63 }
 0x17a   : > { %s2250_s17 = sld [smem:[%s1026_s24 + %s2627_s21]]  ;;  %s943_s20 = sshll.u32 %s1666_s8, 3  ;;  %v606_v5 = vsub.s32 0, %v605_v4  ;;  %v616_v6 = vsub.s32 1, %v605_v4 }
 0x17b   : > { %s500_s4 = scalar_select %p2541_p5, %s2207_s22, 0 }
 0x17c   : > { %s2258_s9 = sshll.u32 %s759_s10, 4  ;;  %s764_s1 = scalar_lea.vmem %s2109_s26, 5 [#allocation2]  ;;  %s2302_s9 = int_to_ptr.vmem [resolvable:$true] %s2258_s9 }
 0x17d   : > { %s2629_s4 = smov (!%p908_p13, %s500_s4), 63  ;;  %s2264_s22 = scalar_lea.vmem %s2488_s2, %s943_s20 }
 0x17e   : > { %s913_s7 = sshll.u32 %s2629_s4, 4  ;;  %s2269_s21 = sshll.u32 %s764_s1, 4  ;;  %s2313_s21 = int_to_ptr.vmem [resolvable:$true] %s2269_s21 }
 0x17f   : > { %s505_s24 = scalar_lea.hbm %s2492_s6, %s913_s7 }
 0x180   : > { %s1444_s8 = scalar_lea.hbm %s505_s24, 16  ;;  %p1449_p4 = scmp.lt.u32.totalorder %s505_s24, %s2492_s6 }
 0x181   : > { %p1445_p0 = scmp.ne.s32.totalorder %s505_s24, %s1444_s8  ;;  %p1450_p3 = scmp.lt.u32.totalorder %s1876_s12, %s1444_s8 }
 0x182   : > { %p1452_p11 = scmp.lt.u32.totalorder %s1444_s8, %s505_s24 }
 0x183   : > { %p1446_p12 = pnand %p1445_p0, %p2535_p2  ;;  %p1451_p1 = por %p1450_p3, %p1449_p4 }
 0x185   : > { %p1447_p7 = pneg %p1446_p12  ;;  %p1453_p10 = por %p1452_p11, %p1451_p1 }
 0x187   : > { %p1454_p9 = pnand %p1453_p10, %p1447_p7 }
 0x189   : > { %1457 = shalt.err (!%p1454_p9)  }
 0x18a   : > { %s1458_s20 = scalar_lea.vmem %s2253_s25, 16  ;;  %p1465_p13 = scmp.lt.s32.totalorder %s2253_s25, %s1853_s11 }
 0x18b   : > { %p1459_p8 = scmp.ne.s32.totalorder %s2253_s25, %s1458_s20  ;;  %p1466_p0 = scmp.lt.s32.totalorder %s1887_s29, %s1458_s20 }
 0x18d   : > { %p1460_p6 = pnand %p1459_p8, %p2535_p2  ;;  %p1467_p12 = por %p1466_p0, %p1465_p13 }
 0x18f   : > { %p1461_p5 = pneg %p1460_p6 }
 0x191   : > { %p1468_p3 = pnand %p1467_p12, %p1461_p5 }
 0x193   : > { %1471 = shalt.err (!%p1468_p3)  }
 0x194   : > { %1025 = dma.hbm_to_vmem [thread:$0]  (%p2535_p2), %s505_s24, 16, %s2253_s25, %s2152_s5  ;;  %v603_v7 = vld [vmem:[%s2489_s3] sm:$0x3]  ;;  %v612_v11 = vpop.permute.xlu0 %611 }
 0x195   : > { %p520_p7 = scmp.gt.s32.totalorder %s2250_s17, 0  ;;  %p915_p4 = scmp.lt.s32.totalorder %s2250_s17, 63  ;;  %v607_v8 = vrot.slane %v603_v7, %v606_v5  ;;  %v617_v9 = vrot.slane %v603_v7, %v616_v6  ;;  %v621_v10 = vld [vmem:[%s2264_s22] sm:$0xff]  ;;  %vm613_vm1 = vcmp.eq.s32.totalorder %v612_v11, 1 }
 0x196   : > { %s1029_s23 = scalar_select %p2535_p2, [#allocation5], [#allocation55] }
 0x197   : > { %s2631_s17 = smov (!%p520_p7, %s2250_s17), 0  ;;  %s2542_s27 = sadd.s32 5, %s1821_s18  ;;  %v618_v12 = vsel %vm613_vm1, %v617_v9, %v607_v8 }
 0x198   : > { %s2633_s27 = smov (!%p2535_p2, %s2542_s27), 0  ;;  %s2635_s17 = smov (!%p915_p4, %s2631_s17), 63  ;;  %v2310_v13 = vadd.f32 %v621_v10, %v618_v12 }
 0x199   : > { %s2304_s25 = sld [smem:[%s1029_s23 + %s2633_s27]]  ;;  %s581_s16 = sadd.s32 7, %s1821_s18 }
 0x19a   : > { %s920_s14 = sshll.u32 %s2635_s17, 4 }
 0x19b   : > { %s526_s10 = scalar_lea.hbm %s2492_s6, %s920_s14 }
 0x19c   : > { %s1472_s4 = scalar_lea.hbm %s526_s10, 16  ;;  %p1477_p9 = scmp.lt.u32.totalorder %s526_s10, %s2492_s6 }
 0x19d   : > { %p1473_p1 = scmp.ne.s32.totalorder %s526_s10, %s1472_s4  ;;  %p1478_p8 = scmp.lt.u32.totalorder %s1876_s12, %s1472_s4 }
 0x19e   : > { %p1480_p5 = scmp.lt.u32.totalorder %s1472_s4, %s526_s10 }
 0x19f   : > { %p1474_p11 = pnand %p1473_p1, %p2535_p2  ;;  %p1479_p6 = por %p1478_p8, %p1477_p9 }
 0x1a1   : > { %p1475_p10 = pneg %p1474_p11  ;;  %p1481_p13 = por %p1480_p5, %p1479_p6 }
 0x1a3   : > { %p1482_p0 = pnand %p1481_p13, %p1475_p10 }
 0x1a5   : > { %1485 = shalt.err (!%p1482_p0)  }
 0x1a6   : > { %s1486_s17 = scalar_lea.vmem %s2302_s9, 16  ;;  %p1493_p4 = scmp.lt.s32.totalorder %s2302_s9, %s1853_s11 }
 0x1a7   : > { %p1487_p12 = scmp.ne.s32.totalorder %s2302_s9, %s1486_s17  ;;  %p1494_p1 = scmp.lt.s32.totalorder %s1887_s29, %s1486_s17 }
 0x1a9   : > { %p1488_p3 = pnand %p1487_p12, %p2535_p2  ;;  %p1495_p11 = por %p1494_p1, %p1493_p4 }
 0x1ab   : > { %p1489_p7 = pneg %p1488_p3 }
 0x1ad   : > { %p1496_p8 = pnand %p1495_p11, %p1489_p7 }
 0x1af   : > { %1499 = shalt.err (!%p1496_p8)  }
 0x1b0   : > { %1028 = dma.hbm_to_vmem [thread:$0]  (%p2535_p2), %s526_s10, 16, %s2302_s9, %s2152_s5 }
 0x1b1   : > { %s1032_s1 = scalar_select %p2535_p2, [#allocation5], [#allocation56] }
 0x1b2   : > { %s2543_s7 = sadd.s32 6, %s1821_s18  ;;  %p541_p10 = scmp.gt.s32.totalorder %s2304_s25, 0 }
 0x1b3   : > { %s2637_s7 = smov (!%p2535_p2, %s2543_s7), 0  ;;  %p922_p9 = scmp.lt.s32.totalorder %s2304_s25, 63 }
 0x1b4   : > { %s2340_s23 = sld [smem:[%s1032_s1 + %s2637_s7]]  ;;  %s769_s27 = scalar_lea.vmem %s2109_s26, 6 [#allocation2] }
 0x1b5   : > { %s2639_s25 = smov (!%p541_p10, %s2304_s25), 0  ;;  %s2643_s16 = smov (!%p2535_p2, %s581_s16), 0 }
 0x1b6   : > { %s1035_s14 = scalar_select %p2535_p2, [#allocation5], [#allocation57] }
 0x1b7   : > { %s2641_s25 = smov (!%p922_p9, %s2639_s25), 63  ;;  %s577_s24 = sshll.u32 %s769_s27, 4  ;;  %s578_s24 = int_to_ptr.vmem [resolvable:$true] %s577_s24 }
 0x1b8   : > { %s927_s9 = sshll.u32 %s2641_s25, 4 }
 0x1b9   : > { %s547_s4 = scalar_lea.hbm %s2492_s6, %s927_s9 }
 0x1ba   : > { %s1500_s22 = scalar_lea.hbm %s547_s4, 16  ;;  %p1505_p12 = scmp.lt.u32.totalorder %s547_s4, %s2492_s6 }
 0x1bb   : > { %p1501_p5 = scmp.ne.s32.totalorder %s547_s4, %s1500_s22  ;;  %p1506_p3 = scmp.lt.u32.totalorder %s1876_s12, %s1500_s22 }
 0x1bc   : > { %p1508_p4 = scmp.lt.u32.totalorder %s1500_s22, %s547_s4 }
 0x1bd   : > { %p1502_p13 = pnand %p1501_p5, %p2535_p2  ;;  %p1507_p7 = por %p1506_p3, %p1505_p12 }
 0x1bf   : > { %p1503_p0 = pneg %p1502_p13  ;;  %p1509_p1 = por %p1508_p4, %p1507_p7 }
 0x1c1   : > { %p1510_p11 = pnand %p1509_p1, %p1503_p0 }
 0x1c3   : > { %1513 = shalt.err (!%p1510_p11)  }
 0x1c4   : > { %s1514_s18 = scalar_lea.vmem %s2313_s21, 16  ;;  %p1521_p5 = scmp.lt.s32.totalorder %s2313_s21, %s1853_s11 }
 0x1c5   : > { %p1515_p8 = scmp.ne.s32.totalorder %s2313_s21, %s1514_s18  ;;  %p1522_p13 = scmp.lt.s32.totalorder %s1887_s29, %s1514_s18 }
 0x1c7   : > { %p1516_p10 = pnand %p1515_p8, %p2535_p2  ;;  %p1523_p6 = por %p1522_p13, %p1521_p5 }
 0x1c9   : > { %p1517_p9 = pneg %p1516_p10 }
 0x1cb   : > { %p1524_p3 = pnand %p1523_p6, %p1517_p9 }
 0x1cd   : > { %1527 = shalt.err (!%p1524_p3)  }
 0x1ce   : > { %1031 = dma.hbm_to_vmem [thread:$0]  (%p2535_p2), %s547_s4, 16, %s2313_s21, %s2152_s5 }
 0x1cf   : > { %p2544_p0 = scmp.gt.s32.totalorder %s2340_s23, 0  ;;  %p929_p12 = scmp.lt.s32.totalorder %s2340_s23, 63 }
 0x1d0   : > { %s2378_s1 = sld [smem:[%s1035_s14 + %s2643_s16]]  ;;  %s774_s10 = scalar_lea.vmem %s2109_s26, 7 [#allocation2] }
 0x1d1   : > { %s563_s25 = scalar_select %p2544_p0, %s2340_s23, 0 }
 0x1d3   : > { %s2645_s25 = smov (!%p929_p12, %s563_s25), 63 }
 0x1d4   : > { %s934_s7 = sshll.u32 %s2645_s25, 4 }
 0x1d5   : > { %s568_s8 = scalar_lea.hbm %s2492_s6, %s934_s7 }
 0x1d6   : > { %s1528_s22 = scalar_lea.hbm %s568_s8, 16  ;;  %p1533_p1 = scmp.lt.u32.totalorder %s568_s8, %s2492_s6 }
 0x1d7   : > { %p1529_p6 = scmp.ne.s32.totalorder %s568_s8, %s1528_s22  ;;  %p1534_p11 = scmp.lt.u32.totalorder %s1876_s12, %s1528_s22 }
 0x1d8   : > { %p1536_p10 = scmp.lt.u32.totalorder %s1528_s22, %s568_s8 }
 0x1d9   : > { %p1530_p7 = pnand %p1529_p6, %p2535_p2  ;;  %p1535_p8 = por %p1534_p11, %p1533_p1 }
 0x1db   : > { %p1531_p4 = pneg %p1530_p7  ;;  %p1537_p9 = por %p1536_p10, %p1535_p8 }
 0x1dd   : > { %p1538_p5 = pnand %p1537_p9, %p1531_p4 }
 0x1df   : > { %1541 = shalt.err (!%p1538_p5)  }
 0x1e0   : > { %s1542_s16 = scalar_lea.vmem %s578_s24, 16  ;;  %p1549_p12 = scmp.lt.s32.totalorder %s578_s24, %s1853_s11 }
 0x1e1   : > { %p1543_p13 = scmp.ne.s32.totalorder %s578_s24, %s1542_s16  ;;  %p1550_p6 = scmp.lt.s32.totalorder %s1887_s29, %s1542_s16 }
 0x1e3   : > { %p1544_p3 = pnand %p1543_p13, %p2535_p2  ;;  %p1551_p7 = por %p1550_p6, %p1549_p12 }
 0x1e5   : > { %p1545_p0 = pneg %p1544_p3 }
 0x1e7   : > { %p1552_p1 = pnand %p1551_p7, %p1545_p0 }
 0x1e9   : > { %1555 = shalt.err (!%p1552_p1)  }
 0x1ea   : > { %1034 = dma.hbm_to_vmem [thread:$0]  (%p2535_p2), %s568_s8, 16, %s578_s24, %s2152_s5 }
 0x1eb   : > { %p583_p4 = scmp.gt.s32.totalorder %s2378_s1, 0  ;;  %p936_p11 = scmp.lt.s32.totalorder %s2378_s1, 63 }
 0x1ec   : > { %s598_s26 = sshll.u32 %s774_s10, 4  ;;  %s599_s26 = int_to_ptr.vmem [resolvable:$true] %s598_s26 }
 0x1ed   : > { %s2647_s1 = smov (!%p583_p4, %s2378_s1), 0 }
 0x1ee   : > { %s2649_s1 = smov (!%p936_p11, %s2647_s1), 63 }
 0x1ef   : > { %s941_s23 = sshll.u32 %s2649_s1, 4 }
 0x1f0   : > { %s589_s17 = scalar_lea.hbm %s2492_s6, %s941_s23 }
 0x1f1   : > { %s1556_s18 = scalar_lea.hbm %s589_s17, 16  ;;  %p1561_p5 = scmp.lt.u32.totalorder %s589_s17, %s2492_s6 }
 0x1f2   : > { %p1557_p8 = scmp.ne.s32.totalorder %s589_s17, %s1556_s18  ;;  %p1562_p13 = scmp.lt.u32.totalorder %s1876_s12, %s1556_s18 }
 0x1f3   : > { %p1564_p0 = scmp.lt.u32.totalorder %s1556_s18, %s589_s17 }
 0x1f4   : > { %p1558_p10 = pnand %p1557_p8, %p2535_p2  ;;  %p1563_p3 = por %p1562_p13, %p1561_p5 }
 0x1f6   : > { %p1559_p9 = pneg %p1558_p10  ;;  %p1565_p12 = por %p1564_p0, %p1563_p3 }
 0x1f8   : > { %p1566_p6 = pnand %p1565_p12, %p1559_p9 }
 0x1fa   : > { %1569 = shalt.err (!%p1566_p6)  }
 0x1fb   : > { %s1570_s24 = scalar_lea.vmem %s599_s26, 16  ;;  %p1577_p11 = scmp.lt.s32.totalorder %s599_s26, %s1853_s11 }
 0x1fc   : > { %p1571_p7 = scmp.ne.s32.totalorder %s599_s26, %s1570_s24  ;;  %p1578_p8 = scmp.lt.s32.totalorder %s1887_s29, %s1570_s24 }
 0x1fe   : > { %p1572_p1 = pnand %p1571_p7, %p2535_p2  ;;  %p1579_p10 = por %p1578_p8, %p1577_p11 }
 0x200   : > { %p1573_p4 = pneg %p1572_p1 }
 0x202   : > { %p1580_p5 = pnand %p1579_p10, %p1573_p4 }
 0x204   : > { %1583 = shalt.err (!%p1580_p5)  }
 0x205   : > { %1037 = dma.hbm_to_vmem [thread:$0]  (%p2535_p2), %s589_s17, 16, %s599_s26, %s2152_s5 }
 0x206   : > { %s249_s12 = scalar_lea.vmem [#allocation6], %s1830_s15  ;;  %s2545_s1 = sshll.u32 %s2063_s0, 3 }
 0x207   : > { %s624_s27 = scalar_lea.vmem [#allocation2], %s2545_s1  ;;  %s625_s9 = scalar_lea.sflag [#allocation3], %s2063_s0 }
 0x208   : > { %1646 = dma.done.wait %s625_s9, 128 }
 0x209   : > { %1647 = vsyncadd %s625_s9, 4294967168  ;;  %v629_v14 = vld [vmem:[%s624_s27] sm:$0xff]  ;;  %s2546_s13 = sld [smem:[#allocation71_spill]]  ;;  %s2547_s5 = sld [smem:[#allocation72_spill]] }
 0x20a   : > { %v630_v15 = vadd.f32 %v629_v14, %v2310_v13  ;;  %s949_s8 = sshll.u32 %s1812_s28, 7  ;;  %s676_s10 = sshll.u32 %s249_s12, 4  ;;  %s2433_s10 = int_to_ptr.vmem [resolvable:$true] %s676_s10 }
 0x20b   : > { %s2548_s4 = sld [smem:[#allocation73_spill]]  ;;  %s2549_s26 = sand.u32 1, %s1658_s30  }
 0x20c   : > { %631 = vadd.xlane.f32.xlu0 %v630_v15  ;;  %s661_s23 = scalar_lea.sflag [#allocation7], %s2549_s26  ;;  %s1584_s14 = scalar_lea.vmem %s2433_s10, 128 }
 0x20d   : > { %p1585_p2 = scmp.ne.s32.totalorder %s2433_s10, %s1584_s14  ;;  %p2550_p9 = scmp.ne.s32.totalorder %s2520_s19, 0 }
 0x20e   : > { %s1694_s28 = smov [#allocation6]  }
 0x20f   : > { %v945_v24 = vld [vmem:[%s2546_s13] ss:$0 sm:$0xff]  ;;  %p1586_p13 = pnand %p1585_p2, %p2550_p9  ;;  %s1588_s20 = sshll.u32 %s1694_s28, 4  ;;  %s1589_s20 = int_to_ptr.vmem [resolvable:$false] %s1588_s20 }
 0x210   : > { %v946_v26 = vld [vmem:[%s2547_s5] ss:$0 sm:$0xff]  ;;  %s1590_s17 = scalar_lea.vmem %s1589_s20, 256  ;;  %p1591_p0 = scmp.lt.s32.totalorder %s2433_s10, %s1589_s20 }
 0x211   : > { %s2431_s16 = scalar_lea.hbm %s2548_s4, %s949_s8  ;;  %p1587_p3 = pneg %p1586_p13 }
 0x212   : > { %p1592_p12 = scmp.lt.s32.totalorder %s1590_s17, %s1584_s14 }
 0x214   : > { %p1593_p6 = por %p1592_p12, %p1591_p0 }
 0x216   : > { %p1594_p7 = pnand %p1593_p6, %p1587_p3 }
 0x299   : > { %v632_v16 = vpop.xlane.xlu0 %631 }
 0x29a   : > { %v634_v17 = vmul.f32 0.0078125, %v632_v16 }
 0x29c   : > { %v635_v18 = vsub.f32 %v630_v15, %v634_v17 }
 0x29e   : > { %v636_v19 = vmul.f32 %v635_v18, %v635_v18 }
 0x2a0   : > { %637 = vadd.xlane.f32.xlu0 %v636_v19 }
 0x32d   : > { %v638_v20 = vpop.xlane.xlu0 %637 }
 0x32e   : > { %v639_v21 = vmul.f32 0.0078125, %v638_v20 }
 0x330   : > { %v640_v22 = vadd.f32 1e-12, %v639_v21 }
 0x332   : > { %1122 = vrsqrt.f32 %v640_v22 }
 0x33c   : > { %v1123_v23 = vpop.eup %1122 }
 0x33d   : > { %v642_v25 = vmul.f32 %v1123_v23, %v635_v18 }
 0x33f   : > { %v650_v27 = vmul.f32 %v945_v24, %v642_v25 }
 0x341   : > { %v658_v28 = vadd.f32 %v946_v26, %v650_v27 }
 0x343   : > { %659 = vst [vmem:[%s249_s12] sm:$0xff] %v658_v28 }
 0x344   : > { %1597 = shalt.err (!%p1594_p7)
}
 0x345   : > { %s1598_s18 = scalar_lea.hbm %s2431_s16, 128  ;;  %s1602_s24 = scalar_lea.hbm %s2548_s4, 512 }
 0x346   : > { %p1599_p1 = scmp.ne.s32.totalorder %s2431_s16, %s1598_s18  ;;  %p1603_p8 = scmp.lt.u32.totalorder %s2431_s16, %s2548_s4 }
 0x347   : > { %p1604_p10 = scmp.lt.u32.totalorder %s1602_s24, %s1598_s18  ;;  %p1606_p2 = scmp.lt.u32.totalorder %s1598_s18, %s2431_s16 }
 0x348   : > { %p1600_p4 = pnand %p1599_p1, %p2550_p9 }
 0x349   : > { %p1605_p5 = por %p1604_p10, %p1603_p8 }
 0x34a   : > { %p1601_p11 = pneg %p1600_p4 }
 0x34b   : > { %p1607_p13 = por %p1606_p2, %p1605_p5 }
 0x34d   : > { %p1608_p3 = pnand %p1607_p13, %p1601_p11 }
 0x34f   : > { %1611 = shalt.err (!%p1608_p3)
}
 0x350   : > { %1038 = dma.vmem_to_hbm [thread:$0]  (%p2550_p9), %s2433_s10, 128, %s2431_s16, %s661_s23  }
 0x351 PF: > { %s2551_s27 = sld [smem:[#allocation65_spill]]  ;;  %s2552_s9 = sld [smem:[#allocation61_spill]] }
 0x352   : > { %s2553_s11 = sld [smem:[#allocation68_spill]] }
 0x357   : > { %p1046_p0 = scmp.ge.s32.totalorder %s2551_s27, 2  ;;  %s688_s15 = sand.u32 1, %s2552_s9  }
 0x358   : > { %p2554_p12 = scmp.ne.s32.totalorder %s2553_s11, 0  ;;  %s689_s13 = scalar_lea.sflag [#allocation7], %s688_s15 }
 0x35a   : > { %p1041_p6 = pnand %p1046_p0, %p2554_p12 }
 0x35c   : > { %1649 = dma.done.wait (!%p1041_p6), %s689_s13, 128  }
 0x35d   : > { %1651 = vsyncadd (!%p1041_p6), %s689_s13, 4294967168  ;;  %s26_s12 = sadd.s32 1, %s2551_s27   ;;  %s2555_s0 = sld [smem:[#allocation62_spill]] }
 0x35e   : > { %p23_p7 = scmp.ge.s32.totalorder %s26_s12, 6   ;;  %s2556_s19 = sld [smem:[#allocation69_spill]] }
 0x35f   : > { %s2557_s8 = sld [smem:[#allocation63_spill]]  ;;  %s2558_s9 = sld [smem:[#allocation64_spill]] }
 0x360   : > { %s2559_s10 = sld [smem:[#allocation66_spill]]  ;;  %s2560_s11 = sld [smem:[#allocation67_spill]] }
 0x361   : > { %s2561_s29 = smov %s1658_s30  ;;  %25 = sbr.rel (!%p23_p7) target bundleno = 22 (0x16), region = 183 }
 0x363   : > { %s2562_s30 = smov %s2555_s0 }
 0x364   : > { %s2563_s0 = smov %s2556_s19 }
 0x368   :  { %694 = vsyncpa [#allocation7], 1 }
 0x369   :  { %696 = vsyncpa [#allocation7 + $0x1], 1 }
 0x36a   :  { %697 = vsyncmov [#allocation3] }
 0x36d   :  { %s698_s5 = vpop.sfrf %697 }
 0x36e   :  { %p952_p9 = scmp.ne.s32.totalorder %s698_s5, 0 }
 0x370   :  { %702 = shalt.err (%p952_p9)  }
 0x371   :  { %704 = vsyncmov [#allocation3 + $0x1] }
 0x374   :  { %s705_s22 = vpop.sfrf %704 }
 0x375   :  { %p953_p1 = scmp.ne.s32.totalorder %s705_s22, 0 }
 0x377   :  { %709 = shalt.err (%p953_p1)  }

</bundles_post_ra>
